<compile_context>
chip_gen: v5e
topology: v5e:2x2
jax: 0.10.0
libtpu: 0.0.40
codegen_flags: <defaults>
</compile_context>

<pallas_src>
import functools

import jax
import jax.numpy as jnp
from jax.experimental import pallas as pl
from jax.experimental.pallas import tpu as pltpu


# ----------------------------------------------------------------------------
# Kernel bodies
# ----------------------------------------------------------------------------
def _attn_body(causal, x, kv, kp, wq, bq, wk, bk, wv, bv, wo, bo, gam, bet,
               o_ref, acc_ref):
    """One (batch, head) grid step of fused attention + residual + LayerNorm.

    x:  [Sq, D] f32 (query input == residual)     kv: [Sk, D] f32
    kp: [1, Sk] f32 additive key-padding bias
    wq/wk/wv: [D, Dh] bf16 (wq pre-scaled by 1/sqrt(Dh))   bq/bk/bv: [1, Dh] f32
    wo: [Dh, D] bf16   bo/gam/bet: [1, D] f32
    acc_ref: VMEM f32 [Sq, D] accumulator over heads
    """
    h = pl.program_id(1)
    nh = pl.num_programs(1)

    @pl.when(h == 0)
    def _():
        acc_ref[...] = jnp.zeros_like(acc_ref)

    xb = x.astype(jnp.bfloat16)
    kvb = kv.astype(jnp.bfloat16)

    q = jnp.dot(xb, wq, preferred_element_type=jnp.float32) + bq    # [Sq, Dh]
    k = jnp.dot(kvb, wk, preferred_element_type=jnp.float32) + bk   # [Sk, Dh]
    v = jnp.dot(kvb, wv, preferred_element_type=jnp.float32) + bv   # [Sk, Dh]

    # scores = q @ k^T  (contract last dims; bf16 operands, f32 accumulate)
    scores = jax.lax.dot_general(
        q.astype(jnp.bfloat16), k.astype(jnp.bfloat16),
        (((1,), (1,)), ((), ())),
        preferred_element_type=jnp.float32)                         # [Sq, Sk]
    scores = scores + kp                                            # padding bias
    if causal:
        r = jax.lax.broadcasted_iota(jnp.int32, scores.shape, 0)
        c = jax.lax.broadcasted_iota(jnp.int32, scores.shape, 1)
        scores = jnp.where(c > r, -1e9, scores)

    # softmax in f32 (max-subtract); normalization folded in via reciprocal
    m = jnp.max(scores, axis=-1, keepdims=True)
    p = jnp.exp(scores - m)
    inv_l = pl.reciprocal(jnp.sum(p, axis=-1, keepdims=True), approx=True)

    ctx = jnp.dot(p.astype(jnp.bfloat16), v.astype(jnp.bfloat16),
                  preferred_element_type=jnp.float32) * inv_l       # [Sq, Dh]

    # per-head slice of the output projection, accumulated over heads
    acc_ref[...] += jnp.dot(ctx.astype(jnp.bfloat16), wo,
                            preferred_element_type=jnp.float32)     # [Sq, D]

    @pl.when(h == nh - 1)
    def _():
        s = x + acc_ref[...] + bo                 # residual + attention output
        mean = jnp.mean(s, axis=-1, keepdims=True)
        var = jnp.mean((s - mean) * (s - mean), axis=-1, keepdims=True)
        y = (s - mean) * jax.lax.rsqrt(var + 1e-5)
        o_ref[0] = (y * gam + bet).astype(o_ref.dtype)


def _self_attn_ln_kernel(causal, x_ref, kp_ref,
                         wq_ref, bq_ref, wk_ref, bk_ref, wv_ref, bv_ref,
                         wo_ref, bo_ref, g_ref, b_ref,
                         o_ref, acc_ref):
    x = x_ref[0]
    _attn_body(causal, x, x, kp_ref[0],
               wq_ref[0], bq_ref[0], wk_ref[0], bk_ref[0],
               wv_ref[0], bv_ref[0], wo_ref[0], bo_ref[...],
               g_ref[...], b_ref[...], o_ref, acc_ref)


def _cross_attn_ln_kernel(causal, xq_ref, xkv_ref, kp_ref,
                          wq_ref, bq_ref, wk_ref, bk_ref, wv_ref, bv_ref,
                          wo_ref, bo_ref, g_ref, b_ref,
                          o_ref, acc_ref):
    _attn_body(causal, xq_ref[0], xkv_ref[0], kp_ref[0],
               wq_ref[0], bq_ref[0], wk_ref[0], bk_ref[0],
               wv_ref[0], bv_ref[0], wo_ref[0], bo_ref[...],
               g_ref[...], b_ref[...], o_ref, acc_ref)


def _ff_ln_kernel(x_ref, w1_ref, b1_ref, w2_ref, b2_ref, g_ref, b_ref, o_ref):
    """FeedForward(ReLU MLP) + residual + LayerNorm on a [TR, D] row tile."""
    x = x_ref[...]                                            # [TR, D] f32
    xb = x.astype(jnp.bfloat16)
    h = jnp.dot(xb, w1_ref[...], preferred_element_type=jnp.float32) + b1_ref[...]
    h = jnp.maximum(h, 0.0)                                   # ReLU in f32
    y = jnp.dot(h.astype(jnp.bfloat16), w2_ref[...],
                preferred_element_type=jnp.float32) + b2_ref[...]
    s = x + y                                                 # residual
    mean = jnp.mean(s, axis=-1, keepdims=True)
    var = jnp.mean((s - mean) * (s - mean), axis=-1, keepdims=True)
    n = (s - mean) * jax.lax.rsqrt(var + 1e-5)
    o_ref[...] = (n * g_ref[...] + b_ref[...]).astype(o_ref.dtype)


# ----------------------------------------------------------------------------
# pallas_call wrappers
# ----------------------------------------------------------------------------
def _attn_add_ln(xq, xkv, kp_bias, attn_p, ln_p, num_heads, causal, is_self):
    B, Sq, D = xq.shape
    Sk = xkv.shape[1]
    H = num_heads
    dh = D // H

    act_q_spec = pl.BlockSpec((1, Sq, D), lambda b, h: (b, 0, 0))
    act_kv_spec = pl.BlockSpec((1, Sk, D), lambda b, h: (b, 0, 0))
    kp_spec = pl.BlockSpec((1, 1, Sk), lambda b, h: (b, 0, 0))
    w_in_spec = pl.BlockSpec((1, D, dh), lambda b, h: (h, 0, 0))
    b_in_spec = pl.BlockSpec((1, 1, dh), lambda b, h: (h, 0, 0))
    w_out_spec = pl.BlockSpec((1, dh, D), lambda b, h: (h, 0, 0))
    vec_spec = pl.BlockSpec((1, D), lambda b, h: (0, 0))

    weights = [attn_p["wq"], attn_p["bq"], attn_p["wk"], attn_p["bk"],
               attn_p["wv"], attn_p["bv"], attn_p["wo"], attn_p["bo"],
               ln_p["gamma"], ln_p["beta"]]
    w_specs = [w_in_spec, b_in_spec, w_in_spec, b_in_spec,
               w_in_spec, b_in_spec, w_out_spec, vec_spec, vec_spec, vec_spec]

    if is_self:
        kernel = functools.partial(_self_attn_ln_kernel, causal)
        inputs = [xq, kp_bias] + weights
        in_specs = [act_q_spec, kp_spec] + w_specs
    else:
        kernel = functools.partial(_cross_attn_ln_kernel, causal)
        inputs = [xq, xkv, kp_bias] + weights
        in_specs = [act_q_spec, act_kv_spec, kp_spec] + w_specs

    flops = 2 * B * D * (Sq * D + 2 * Sk * D + 2 * Sq * Sk)
    bytes_acc = (sum(int(a.size) * a.dtype.itemsize for a in inputs)
                 + B * Sq * D * 4)

    return pl.pallas_call(
        kernel,
        out_shape=jax.ShapeDtypeStruct((B, Sq, D), xq.dtype),
        grid=(B, H),
        in_specs=in_specs,
        out_specs=pl.BlockSpec((1, Sq, D), lambda b, h: (b, 0, 0)),
        scratch_shapes=[pltpu.VMEM((Sq, D), jnp.float32)],
        compiler_params=pltpu.CompilerParams(
            dimension_semantics=("parallel", "arbitrary")),
        cost_estimate=pl.CostEstimate(
            flops=int(flops),
            transcendentals=int(B * H * Sq * (Sk + 1) + B * Sq),
            bytes_accessed=int(bytes_acc)),
    )(*inputs)


def _row_tile(rows):
    for t in (512, 256, 128, 64, 32, 16, 8):
        if rows % t == 0:
            return t
    return rows


def ff_add_ln(x, ff_p, ln_p):
    B, S, D = x.shape
    R = B * S
    Hf = ff_p["w1"].shape[1]
    xf = x.reshape(R, D)
    TR = _row_tile(R)

    row_spec = pl.BlockSpec((TR, D), lambda i: (i, 0))
    inputs = [xf, ff_p["w1"], ff_p["b1"], ff_p["w2"], ff_p["b2"],
              ln_p["gamma"], ln_p["beta"]]
    in_specs = [row_spec,
                pl.BlockSpec((D, Hf), lambda i: (0, 0)),
                pl.BlockSpec((1, Hf), lambda i: (0, 0)),
                pl.BlockSpec((Hf, D), lambda i: (0, 0)),
                pl.BlockSpec((1, D), lambda i: (0, 0)),
                pl.BlockSpec((1, D), lambda i: (0, 0)),
                pl.BlockSpec((1, D), lambda i: (0, 0))]

    flops = 4 * R * D * Hf
    bytes_acc = sum(int(a.size) * a.dtype.itemsize for a in inputs) + R * D * 4

    out = pl.pallas_call(
        _ff_ln_kernel,
        out_shape=jax.ShapeDtypeStruct((R, D), x.dtype),
        grid=(R // TR,),
        in_specs=in_specs,
        out_specs=row_spec,
        compiler_params=pltpu.CompilerParams(dimension_semantics=("parallel",)),
        cost_estimate=pl.CostEstimate(flops=int(flops), transcendentals=int(R),
                                      bytes_accessed=int(bytes_acc)),
    )(*inputs)
    return out.reshape(B, S, D)


# ----------------------------------------------------------------------------
# Decoder layer forward (plain-JAX glue)
# ----------------------------------------------------------------------------
def _padding_bias(mask, B, Sk):
    """bool [B, Sk] (True = pad) -> additive f32 [B, 1, Sk]."""
    if mask is None:
        return jnp.zeros((B, 1, Sk), jnp.float32)
    return jnp.where(mask, -1e9, 0.0).astype(jnp.float32)[:, None, :]


def decoder_layer(x, memory, params, num_heads, causal=True,
                  target_padding_mask=None, memory_padding_mask=None):
    # TODO(synk): arbitrary (non-causal) precomputed target_mask arrays are not
    # plumbed through; the causal target mask is generated in-kernel via iota.
    B, Sq, D = x.shape
    Sk = memory.shape[1]
    tgt_kp = _padding_bias(target_padding_mask, B, Sq)
    mem_kp = _padding_bias(memory_padding_mask, B, Sk)

    # x = norm1(x + self_attn(x, x, x))
    x = _attn_add_ln(x, x, tgt_kp, params["self_attn"], params["norm1"],
                     num_heads, causal=causal, is_self=True)
    # x = norm2(x + cross_attn(x, memory, memory))
    x = _attn_add_ln(x, memory, mem_kp, params["cross_attn"], params["norm2"],
                     num_heads, causal=False, is_self=False)
    # x = norm3(x + ff(x))
    x = ff_add_ln(x, params["ff"], params["norm3"])
    return x


# ----------------------------------------------------------------------------
# Parameter construction (deterministic, synthetic) in kernel layout
# ----------------------------------------------------------------------------
def _init_attn(key, D, H):
    dh = D // H
    ks = jax.random.split(key, 8)
    s = 0.02
    wq = s * jax.random.normal(ks[0], (D, D), jnp.float32)
    wk = s * jax.random.normal(ks[1], (D, D), jnp.float32)
    wv = s * jax.random.normal(ks[2], (D, D), jnp.float32)
    wo = s * jax.random.normal(ks[3], (D, D), jnp.float32)
    bq = s * jax.random.normal(ks[4], (D,), jnp.float32)
    bk = s * jax.random.normal(ks[5], (D,), jnp.float32)
    bv = s * jax.random.normal(ks[6], (D,), jnp.float32)
    bo = s * jax.random.normal(ks[7], (D,), jnp.float32)

    scale = 1.0 / float(dh) ** 0.5          # folded into wq / bq

    def head_in(w):   # [D, D] -> [H, D, dh]  (per-head input-projection slice)
        return jnp.transpose(w.reshape(D, H, dh), (1, 0, 2))

    def head_b(b):    # [D] -> [H, 1, dh]
        return b.reshape(H, 1, dh)

    return dict(
        wq=head_in(wq * scale).astype(jnp.bfloat16),
        bq=head_b(bq * scale),
        wk=head_in(wk).astype(jnp.bfloat16),
        bk=head_b(bk),
        wv=head_in(wv).astype(jnp.bfloat16),
        bv=head_b(bv),
        wo=wo.reshape(H, dh, D).astype(jnp.bfloat16),   # per-head out-proj rows
        bo=bo.reshape(1, D),
    )


def _init_ff(key, D):
    # TODO(synk): FeedForward internals unspecified in the reference; assuming
    # Linear(D, 4D) -> ReLU -> Linear(4D, D) (dropout omitted, eval-mode).
    ks = jax.random.split(key, 4)
    Hf = 4 * D
    s = 0.02
    return dict(
        w1=(s * jax.random.normal(ks[0], (D, Hf), jnp.float32)).astype(jnp.bfloat16),
        b1=s * jax.random.normal(ks[1], (1, Hf), jnp.float32),
        w2=(s * jax.random.normal(ks[2], (Hf, D), jnp.float32)).astype(jnp.bfloat16),
        b2=s * jax.random.normal(ks[3], (1, D), jnp.float32),
    )


def _init_ln(D):
    return dict(gamma=jnp.ones((1, D), jnp.float32),
                beta=jnp.zeros((1, D), jnp.float32))


def init_decoder_layer_params(key, embed_dim, num_heads):
    k_self, k_cross, k_ff = jax.random.split(key, 3)
    return dict(
        self_attn=_init_attn(k_self, embed_dim, num_heads),
        cross_attn=_init_attn(k_cross, embed_dim, num_heads),
        ff=_init_ff(k_ff, embed_dim),
        norm1=_init_ln(embed_dim),
        norm2=_init_ln(embed_dim),
        norm3=_init_ln(embed_dim),
    )


# ----------------------------------------------------------------------------
if __name__ == "__main__":
    B, S_TGT, S_MEM = 2, 8, 8
    EMBED_DIM, NUM_HEADS = 32, 4

    key = jax.random.PRNGKey(0)
    kx, kmem, kparams = jax.random.split(key, 3)
    x = jax.random.normal(kx, (B, S_TGT, EMBED_DIM), jnp.float32)
    memory = jax.random.normal(kmem, (B, S_MEM, EMBED_DIM), jnp.float32)

    params = init_decoder_layer_params(kparams, EMBED_DIM, NUM_HEADS)

    fwd = jax.jit(functools.partial(decoder_layer,
                                    num_heads=NUM_HEADS, causal=True))
    out = jax.block_until_ready(fwd(x, memory, params))

    assert out.shape == (B, S_TGT, EMBED_DIM)
    assert bool(jnp.all(jnp.isfinite(out)))
    print("KERNEL_OK")
</pallas_src>

<mosaic_0001>
module attributes {stable_mosaic.version = 11 : i64} {
  func.func @_self_attn_ln_kernel(%arg0: i32, %arg1: i32, %arg2: memref<1x8x32xf32, #tpu.memory_space<vmem>>, %arg3: memref<1x1x8xf32, #tpu.memory_space<vmem>>, %arg4: memref<1x32x8xbf16, #tpu.memory_space<vmem>>, %arg5: memref<1x1x8xf32, #tpu.memory_space<vmem>>, %arg6: memref<1x32x8xbf16, #tpu.memory_space<vmem>>, %arg7: memref<1x1x8xf32, #tpu.memory_space<vmem>>, %arg8: memref<1x32x8xbf16, #tpu.memory_space<vmem>>, %arg9: memref<1x1x8xf32, #tpu.memory_space<vmem>>, %arg10: memref<1x8x32xbf16, #tpu.memory_space<vmem>>, %arg11: memref<1x32xf32, #tpu.memory_space<vmem>>, %arg12: memref<1x32xf32, #tpu.memory_space<vmem>>, %arg13: memref<1x32xf32, #tpu.memory_space<vmem>>, %arg14: memref<1x8x32xf32, #tpu.memory_space<vmem>>, %arg15: memref<8x32xf32, #tpu.memory_space<vmem>>) attributes {dimension_semantics = [#tpu.dimension_semantics<parallel>, #tpu.dimension_semantics<arbitrary>], iteration_bounds = array<i64: 2, 4>, scalar_prefetch = 0 : i64, scratch_operands = 1 : i64, tpu.core_type = #tpu.core_type<tc>, window_params = [{transform_indices = @transform_0, window_bounds = array<i64: 1, 8, 32>}, {transform_indices = @transform_1, window_bounds = array<i64: 1, 1, 8>}, {transform_indices = @transform_2, window_bounds = array<i64: 1, 32, 8>}, {transform_indices = @transform_3, window_bounds = array<i64: 1, 1, 8>}, {transform_indices = @transform_4, window_bounds = array<i64: 1, 32, 8>}, {transform_indices = @transform_5, window_bounds = array<i64: 1, 1, 8>}, {transform_indices = @transform_6, window_bounds = array<i64: 1, 32, 8>}, {transform_indices = @transform_7, window_bounds = array<i64: 1, 1, 8>}, {transform_indices = @transform_8, window_bounds = array<i64: 1, 8, 32>}, {pipeline_mode = #tpu.pipeline_mode<synchronous>, transform_indices = @transform_9, window_bounds = array<i64: 1, 32>}, {pipeline_mode = #tpu.pipeline_mode<synchronous>, transform_indices = @transform_10, window_bounds = array<i64: 1, 32>}, {pipeline_mode = #tpu.pipeline_mode<synchronous>, transform_indices = @transform_11, window_bounds = array<i64: 1, 32>}, {transform_indices = @transform_12, window_bounds = array<i64: 1, 8, 32>}]} {
    %c0 = arith.constant 0 : index
    %c0_0 = arith.constant 0 : index
    %c0_1 = arith.constant 0 : index
    %0 = vector.load %arg2[%c0, %c0_0, %c0_1] : memref<1x8x32xf32, #tpu.memory_space<vmem>>, vector<1x8x32xf32>
    %1 = vector.shape_cast %0 : vector<1x8x32xf32> to vector<8x32xf32>
    %c0_2 = arith.constant 0 : index
    %c0_3 = arith.constant 0 : index
    %c0_4 = arith.constant 0 : index
    %2 = vector.load %arg3[%c0_2, %c0_3, %c0_4] : memref<1x1x8xf32, #tpu.memory_space<vmem>>, vector<1x1x8xf32>
    %3 = vector.shape_cast %2 : vector<1x1x8xf32> to vector<1x8xf32>
    %c0_5 = arith.constant 0 : index
    %c0_6 = arith.constant 0 : index
    %c0_7 = arith.constant 0 : index
    %4 = vector.load %arg4[%c0_5, %c0_6, %c0_7] : memref<1x32x8xbf16, #tpu.memory_space<vmem>>, vector<1x32x8xbf16>
    %5 = vector.shape_cast %4 : vector<1x32x8xbf16> to vector<32x8xbf16>
    %c0_8 = arith.constant 0 : index
    %c0_9 = arith.constant 0 : index
    %c0_10 = arith.constant 0 : index
    %6 = vector.load %arg5[%c0_8, %c0_9, %c0_10] : memref<1x1x8xf32, #tpu.memory_space<vmem>>, vector<1x1x8xf32>
    %7 = vector.shape_cast %6 : vector<1x1x8xf32> to vector<1x8xf32>
    %c0_11 = arith.constant 0 : index
    %c0_12 = arith.constant 0 : index
    %c0_13 = arith.constant 0 : index
    %8 = vector.load %arg6[%c0_11, %c0_12, %c0_13] : memref<1x32x8xbf16, #tpu.memory_space<vmem>>, vector<1x32x8xbf16>
    %9 = vector.shape_cast %8 : vector<1x32x8xbf16> to vector<32x8xbf16>
    %c0_14 = arith.constant 0 : index
    %c0_15 = arith.constant 0 : index
    %c0_16 = arith.constant 0 : index
    %10 = vector.load %arg7[%c0_14, %c0_15, %c0_16] : memref<1x1x8xf32, #tpu.memory_space<vmem>>, vector<1x1x8xf32>
    %11 = vector.shape_cast %10 : vector<1x1x8xf32> to vector<1x8xf32>
    %c0_17 = arith.constant 0 : index
    %c0_18 = arith.constant 0 : index
    %c0_19 = arith.constant 0 : index
    %12 = vector.load %arg8[%c0_17, %c0_18, %c0_19] : memref<1x32x8xbf16, #tpu.memory_space<vmem>>, vector<1x32x8xbf16>
    %13 = vector.shape_cast %12 : vector<1x32x8xbf16> to vector<32x8xbf16>
    %c0_20 = arith.constant 0 : index
    %c0_21 = arith.constant 0 : index
    %c0_22 = arith.constant 0 : index
    %14 = vector.load %arg9[%c0_20, %c0_21, %c0_22] : memref<1x1x8xf32, #tpu.memory_space<vmem>>, vector<1x1x8xf32>
    %15 = vector.shape_cast %14 : vector<1x1x8xf32> to vector<1x8xf32>
    %c0_23 = arith.constant 0 : index
    %c0_24 = arith.constant 0 : index
    %c0_25 = arith.constant 0 : index
    %16 = vector.load %arg10[%c0_23, %c0_24, %c0_25] : memref<1x8x32xbf16, #tpu.memory_space<vmem>>, vector<1x8x32xbf16>
    %17 = vector.shape_cast %16 : vector<1x8x32xbf16> to vector<8x32xbf16>
    %c0_26 = arith.constant 0 : index
    %c0_27 = arith.constant 0 : index
    %18 = vector.load %arg11[%c0_26, %c0_27] : memref<1x32xf32, #tpu.memory_space<vmem>>, vector<1x32xf32>
    %c0_28 = arith.constant 0 : index
    %c0_29 = arith.constant 0 : index
    %19 = vector.load %arg12[%c0_28, %c0_29] : memref<1x32xf32, #tpu.memory_space<vmem>>, vector<1x32xf32>
    %c0_30 = arith.constant 0 : index
    %c0_31 = arith.constant 0 : index
    %20 = vector.load %arg13[%c0_30, %c0_31] : memref<1x32xf32, #tpu.memory_space<vmem>>, vector<1x32xf32>
    %c0_i32 = arith.constant 0 : i32
    %21 = arith.cmpi eq, %arg1, %c0_i32 : i32
    %22 = arith.extui %21 : i1 to i32
    %c0_i32_32 = arith.constant 0 : i32
    %23 = arith.cmpi ne, %22, %c0_i32_32 : i32
    scf.if %23 {
      %cst_46 = arith.constant 0.000000e+00 : f32
      %66 = vector.broadcast %cst_46 : f32 to vector<8x32xf32>
      %c0_47 = arith.constant 0 : index
      %c0_48 = arith.constant 0 : index
      %67 = vector.load %arg15[%c0_47, %c0_48] : memref<8x32xf32, #tpu.memory_space<vmem>>, vector<8x32xf32>
      tpu.vector_store %arg15[%c0_47, %c0_48], %66 {strides = array<i32>} : memref<8x32xf32, #tpu.memory_space<vmem>>, vector<8x32xf32>,
    } else {
    }
    %24 = arith.truncf %1 : vector<8x32xf32> to vector<8x32xbf16>
    %25 = arith.truncf %1 : vector<8x32xf32> to vector<8x32xbf16>
    %cst = arith.constant dense<0.000000e+00> : vector<8x8xf32>
    %26 = tpu.matmul %24, %5, %cst {dimension_numbers = #tpu.dot_dimension_numbers<[1], [0], [0], [1], [0, 0, 1, 1], [], []>} : vector<8x32xbf16>, vector<32x8xbf16>, vector<8x8xf32> -> vector<8x8xf32>
    %27 = vector.broadcast %7 : vector<1x8xf32> to vector<8x8xf32>
    %28 = arith.addf %26, %27 : vector<8x8xf32>
    %cst_33 = arith.constant dense<0.000000e+00> : vector<8x8xf32>
    %29 = tpu.matmul %25, %9, %cst_33 {dimension_numbers = #tpu.dot_dimension_numbers<[1], [0], [0], [1], [0, 0, 1, 1], [], []>} : vector<8x32xbf16>, vector<32x8xbf16>, vector<8x8xf32> -> vector<8x8xf32>
    %30 = vector.broadcast %11 : vector<1x8xf32> to vector<8x8xf32>
    %31 = arith.addf %29, %30 : vector<8x8xf32>
    %cst_34 = arith.constant dense<0.000000e+00> : vector<8x8xf32>
    %32 = tpu.matmul %25, %13, %cst_34 {dimension_numbers = #tpu.dot_dimension_numbers<[1], [0], [0], [1], [0, 0, 1, 1], [], []>} : vector<8x32xbf16>, vector<32x8xbf16>, vector<8x8xf32> -> vector<8x8xf32>
    %33 = vector.broadcast %15 : vector<1x8xf32> to vector<8x8xf32>
    %34 = arith.addf %32, %33 : vector<8x8xf32>
    %35 = arith.truncf %28 : vector<8x8xf32> to vector<8x8xbf16>
    %36 = arith.truncf %31 : vector<8x8xf32> to vector<8x8xbf16>
    %cst_35 = arith.constant dense<0.000000e+00> : vector<8x8xf32>
    %37 = tpu.matmul %35, %36, %cst_35 {dimension_numbers = #tpu.dot_dimension_numbers<[1], [1], [0], [0], [0, 0, 1, 0], [], []>} : vector<8x8xbf16>, vector<8x8xbf16>, vector<8x8xf32> -> vector<8x8xf32>
    %38 = vector.broadcast %3 : vector<1x8xf32> to vector<8x8xf32>
    %39 = arith.addf %37, %38 : vector<8x8xf32>
    %40 = tpu.iota {dimensions = array<i32: 0>} : vector<8x8xi32>
    %41 = tpu.iota {dimensions = array<i32: 1>} : vector<8x8xi32>
    %42 = arith.cmpi sgt, %41, %40 : vector<8x8xi32>
    %cst_36 = arith.constant -1.000000e+09 : f32
    %43 = vector.broadcast %cst_36 : f32 to vector<8x8xf32>
    %44 = arith.select %42, %43, %39 : vector<8x8xi1>, vector<8x8xf32>
    %cst_37 = arith.constant dense<0xFF800000> : vector<8xf32>
    %45 = vector.multi_reduction <maximumf>, %44, %cst_37 [1] : vector<8x8xf32> to vector<8xf32>
    %46 = vector.shape_cast %45 : vector<8xf32> to vector<8x1xf32>
    %47 = vector.broadcast %46 : vector<8x1xf32> to vector<8x8xf32>
    %48 = arith.subf %44, %47 : vector<8x8xf32>
    %49 = math.exp %48 : vector<8x8xf32>
    %cst_38 = arith.constant dense<0.000000e+00> : vector<8xf32>
    %50 = vector.multi_reduction <add>, %49, %cst_38 [1] : vector<8x8xf32> to vector<8xf32>
    %51 = vector.shape_cast %50 : vector<8xf32> to vector<8x1xf32>
    %52 = tpu.reciprocal %51 {approx = true} : vector<8x1xf32> -> vector<8x1xf32>
    %53 = arith.truncf %49 : vector<8x8xf32> to vector<8x8xbf16>
    %54 = arith.truncf %34 : vector<8x8xf32> to vector<8x8xbf16>
    %cst_39 = arith.constant dense<0.000000e+00> : vector<8x8xf32>
    %55 = tpu.matmul %53, %54, %cst_39 {dimension_numbers = #tpu.dot_dimension_numbers<[1], [0], [0], [1], [0, 0, 1, 1], [], []>} : vector<8x8xbf16>, vector<8x8xbf16>, vector<8x8xf32> -> vector<8x8xf32>
    %56 = vector.broadcast %52 : vector<8x1xf32> to vector<8x8xf32>
    %57 = arith.mulf %55, %56 : vector<8x8xf32>
    %c0_40 = arith.constant 0 : index
    %c0_41 = arith.constant 0 : index
    %58 = vector.load %arg15[%c0_40, %c0_41] : memref<8x32xf32, #tpu.memory_space<vmem>>, vector<8x32xf32>
    %59 = arith.truncf %57 : vector<8x8xf32> to vector<8x8xbf16>
    %cst_42 = arith.constant dense<0.000000e+00> : vector<8x32xf32>
    %60 = tpu.matmul %59, %17, %cst_42 {dimension_numbers = #tpu.dot_dimension_numbers<[1], [0], [0], [1], [0, 0, 1, 1], [], []>} : vector<8x8xbf16>, vector<8x32xbf16>, vector<8x32xf32> -> vector<8x32xf32>
    %61 = arith.addf %58, %60 : vector<8x32xf32>
    %c0_43 = arith.constant 0 : index
    %c0_44 = arith.constant 0 : index
    %62 = vector.load %arg15[%c0_43, %c0_44] : memref<8x32xf32, #tpu.memory_space<vmem>>, vector<8x32xf32>
    tpu.vector_store %arg15[%c0_43, %c0_44], %61 {strides = array<i32>} : memref<8x32xf32, #tpu.memory_space<vmem>>, vector<8x32xf32>,
    %c3_i32 = arith.constant 3 : i32
    %63 = arith.cmpi eq, %arg1, %c3_i32 : i32
    %64 = arith.extui %63 : i1 to i32
    %c0_i32_45 = arith.constant 0 : i32
    %65 = arith.cmpi ne, %64, %c0_i32_45 : i32
    scf.if %65 {
      %c0_46 = arith.constant 0 : index
      %c0_47 = arith.constant 0 : index
      %66 = vector.load %arg15[%c0_46, %c0_47] : memref<8x32xf32, #tpu.memory_space<vmem>>, vector<8x32xf32>
      %67 = arith.addf %1, %66 : vector<8x32xf32>
      %68 = vector.broadcast %18 : vector<1x32xf32> to vector<8x32xf32>
      %69 = arith.addf %67, %68 : vector<8x32xf32>
      %cst_48 = arith.constant dense<0.000000e+00> : vector<8xf32>
      %70 = vector.multi_reduction <add>, %69, %cst_48 [1] : vector<8x32xf32> to vector<8xf32>
      %71 = vector.shape_cast %70 : vector<8xf32> to vector<8x1xf32>
      %cst_49 = arith.constant 3.200000e+01 : f32
      %72 = vector.broadcast %cst_49 : f32 to vector<8x1xf32>
      %73 = arith.divf %71, %72 : vector<8x1xf32>
      %74 = vector.broadcast %73 : vector<8x1xf32> to vector<8x32xf32>
      %75 = arith.subf %69, %74 : vector<8x32xf32>
      %76 = vector.broadcast %73 : vector<8x1xf32> to vector<8x32xf32>
      %77 = arith.subf %69, %76 : vector<8x32xf32>
      %78 = arith.mulf %75, %77 : vector<8x32xf32>
      %cst_50 = arith.constant dense<0.000000e+00> : vector<8xf32>
      %79 = vector.multi_reduction <add>, %78, %cst_50 [1] : vector<8x32xf32> to vector<8xf32>
      %80 = vector.shape_cast %79 : vector<8xf32> to vector<8x1xf32>
      %cst_51 = arith.constant 3.200000e+01 : f32
      %81 = vector.broadcast %cst_51 : f32 to vector<8x1xf32>
      %82 = arith.divf %80, %81 : vector<8x1xf32>
      %83 = vector.broadcast %73 : vector<8x1xf32> to vector<8x32xf32>
      %84 = arith.subf %69, %83 : vector<8x32xf32>
      %cst_52 = arith.constant 9.99999974E-6 : f32
      %85 = vector.broadcast %cst_52 : f32 to vector<8x1xf32>
      %86 = arith.addf %82, %85 : vector<8x1xf32>
      %87 = math.rsqrt %86 : vector<8x1xf32>
      %88 = vector.broadcast %87 : vector<8x1xf32> to vector<8x32xf32>
      %89 = arith.mulf %84, %88 : vector<8x32xf32>
      %90 = vector.broadcast %19 : vector<1x32xf32> to vector<8x32xf32>
      %91 = arith.mulf %89, %90 : vector<8x32xf32>
      %92 = vector.broadcast %20 : vector<1x32xf32> to vector<8x32xf32>
      %93 = arith.addf %91, %92 : vector<8x32xf32>
      %c0_53 = arith.constant 0 : index
      %c0_54 = arith.constant 0 : index
      %c0_55 = arith.constant 0 : index
      %94 = vector.load %arg14[%c0_53, %c0_54, %c0_55] : memref<1x8x32xf32, #tpu.memory_space<vmem>>, vector<1x8x32xf32>
      %95 = vector.shape_cast %94 : vector<1x8x32xf32> to vector<8x32xf32>
      %96 = vector.shape_cast %93 : vector<8x32xf32> to vector<1x8x32xf32>
      tpu.vector_store %arg14[%c0_53, %c0_54, %c0_55], %96 {strides = array<i32>} : memref<1x8x32xf32, #tpu.memory_space<vmem>>, vector<1x8x32xf32>,
    } else {
    }
    return
  }
  func.func @transform_0(%arg0: i32, %arg1: i32) -> (i32, i32, i32) {
    %c0_i32 = arith.constant 0 : i32
    %c0_i32_0 = arith.constant 0 : i32
    %c0_i32_1 = arith.constant 0 : i32
    return %arg0, %c0_i32, %c0_i32_0 : i32, i32, i32
  }
  func.func @transform_1(%arg0: i32, %arg1: i32) -> (i32, i32, i32) {
    %c0_i32 = arith.constant 0 : i32
    %c0_i32_0 = arith.constant 0 : i32
    %c0_i32_1 = arith.constant 0 : i32
    return %arg0, %c0_i32, %c0_i32_0 : i32, i32, i32
  }
  func.func @transform_2(%arg0: i32, %arg1: i32) -> (i32, i32, i32) {
    %c0_i32 = arith.constant 0 : i32
    %c0_i32_0 = arith.constant 0 : i32
    %c0_i32_1 = arith.constant 0 : i32
    return %arg1, %c0_i32, %c0_i32_0 : i32, i32, i32
  }
  func.func @transform_3(%arg0: i32, %arg1: i32) -> (i32, i32, i32) {
    %c0_i32 = arith.constant 0 : i32
    %c0_i32_0 = arith.constant 0 : i32
    %c0_i32_1 = arith.constant 0 : i32
    return %arg1, %c0_i32, %c0_i32_0 : i32, i32, i32
  }
  func.func @transform_4(%arg0: i32, %arg1: i32) -> (i32, i32, i32) {
    %c0_i32 = arith.constant 0 : i32
    %c0_i32_0 = arith.constant 0 : i32
    %c0_i32_1 = arith.constant 0 : i32
    return %arg1, %c0_i32, %c0_i32_0 : i32, i32, i32
  }
  func.func @transform_5(%arg0: i32, %arg1: i32) -> (i32, i32, i32) {
    %c0_i32 = arith.constant 0 : i32
    %c0_i32_0 = arith.constant 0 : i32
    %c0_i32_1 = arith.constant 0 : i32
    return %arg1, %c0_i32, %c0_i32_0 : i32, i32, i32
  }
  func.func @transform_6(%arg0: i32, %arg1: i32) -> (i32, i32, i32) {
    %c0_i32 = arith.constant 0 : i32
    %c0_i32_0 = arith.constant 0 : i32
    %c0_i32_1 = arith.constant 0 : i32
    return %arg1, %c0_i32, %c0_i32_0 : i32, i32, i32
  }
  func.func @transform_7(%arg0: i32, %arg1: i32) -> (i32, i32, i32) {
    %c0_i32 = arith.constant 0 : i32
    %c0_i32_0 = arith.constant 0 : i32
    %c0_i32_1 = arith.constant 0 : i32
    return %arg1, %c0_i32, %c0_i32_0 : i32, i32, i32
  }
  func.func @transform_8(%arg0: i32, %arg1: i32) -> (i32, i32, i32) {
    %c0_i32 = arith.constant 0 : i32
    %c0_i32_0 = arith.constant 0 : i32
    %c0_i32_1 = arith.constant 0 : i32
    return %arg1, %c0_i32, %c0_i32_0 : i32, i32, i32
  }
  func.func @transform_9(%arg0: i32, %arg1: i32) -> (i32, i32) {
    %c0_i32 = arith.constant 0 : i32
    %c0_i32_0 = arith.constant 0 : i32
    %c0_i32_1 = arith.constant 0 : i32
    return %c0_i32, %c0_i32_0 : i32, i32
  }
  func.func @transform_10(%arg0: i32, %arg1: i32) -> (i32, i32) {
    %c0_i32 = arith.constant 0 : i32
    %c0_i32_0 = arith.constant 0 : i32
    %c0_i32_1 = arith.constant 0 : i32
    return %c0_i32, %c0_i32_0 : i32, i32
  }
  func.func @transform_11(%arg0: i32, %arg1: i32) -> (i32, i32) {
    %c0_i32 = arith.constant 0 : i32
    %c0_i32_0 = arith.constant 0 : i32
    %c0_i32_1 = arith.constant 0 : i32
    return %c0_i32, %c0_i32_0 : i32, i32
  }
  func.func @transform_12(%arg0: i32, %arg1: i32) -> (i32, i32, i32) {
    %c0_i32 = arith.constant 0 : i32
    %c0_i32_0 = arith.constant 0 : i32
    %c0_i32_1 = arith.constant 0 : i32
    return %arg0, %c0_i32, %c0_i32_0 : i32, i32, i32
  }
}

module attributes {stable_mosaic.version = 11 : i64} {
  func.func @_cross_attn_ln_kernel(%arg0: i32, %arg1: i32, %arg2: memref<1x8x32xf32, #tpu.memory_space<vmem>>, %arg3: memref<1x8x32xf32, #tpu.memory_space<vmem>>, %arg4: memref<1x1x8xf32, #tpu.memory_space<vmem>>, %arg5: memref<1x32x8xbf16, #tpu.memory_space<vmem>>, %arg6: memref<1x1x8xf32, #tpu.memory_space<vmem>>, %arg7: memref<1x32x8xbf16, #tpu.memory_space<vmem>>, %arg8: memref<1x1x8xf32, #tpu.memory_space<vmem>>, %arg9: memref<1x32x8xbf16, #tpu.memory_space<vmem>>, %arg10: memref<1x1x8xf32, #tpu.memory_space<vmem>>, %arg11: memref<1x8x32xbf16, #tpu.memory_space<vmem>>, %arg12: memref<1x32xf32, #tpu.memory_space<vmem>>, %arg13: memref<1x32xf32, #tpu.memory_space<vmem>>, %arg14: memref<1x32xf32, #tpu.memory_space<vmem>>, %arg15: memref<1x8x32xf32, #tpu.memory_space<vmem>>, %arg16: memref<8x32xf32, #tpu.memory_space<vmem>>) attributes {dimension_semantics = [#tpu.dimension_semantics<parallel>, #tpu.dimension_semantics<arbitrary>], iteration_bounds = array<i64: 2, 4>, scalar_prefetch = 0 : i64, scratch_operands = 1 : i64, tpu.core_type = #tpu.core_type<tc>, window_params = [{transform_indices = @transform_0, window_bounds = array<i64: 1, 8, 32>}, {transform_indices = @transform_1, window_bounds = array<i64: 1, 8, 32>}, {transform_indices = @transform_2, window_bounds = array<i64: 1, 1, 8>}, {transform_indices = @transform_3, window_bounds = array<i64: 1, 32, 8>}, {transform_indices = @transform_4, window_bounds = array<i64: 1, 1, 8>}, {transform_indices = @transform_5, window_bounds = array<i64: 1, 32, 8>}, {transform_indices = @transform_6, window_bounds = array<i64: 1, 1, 8>}, {transform_indices = @transform_7, window_bounds = array<i64: 1, 32, 8>}, {transform_indices = @transform_8, window_bounds = array<i64: 1, 1, 8>}, {transform_indices = @transform_9, window_bounds = array<i64: 1, 8, 32>}, {pipeline_mode = #tpu.pipeline_mode<synchronous>, transform_indices = @transform_10, window_bounds = array<i64: 1, 32>}, {pipeline_mode = #tpu.pipeline_mode<synchronous>, transform_indices = @transform_11, window_bounds = array<i64: 1, 32>}, {pipeline_mode = #tpu.pipeline_mode<synchronous>, transform_indices = @transform_12, window_bounds = array<i64: 1, 32>}, {transform_indices = @transform_13, window_bounds = array<i64: 1, 8, 32>}]} {
    %c0 = arith.constant 0 : index
    %c0_0 = arith.constant 0 : index
    %c0_1 = arith.constant 0 : index
    %0 = vector.load %arg2[%c0, %c0_0, %c0_1] : memref<1x8x32xf32, #tpu.memory_space<vmem>>, vector<1x8x32xf32>
    %1 = vector.shape_cast %0 : vector<1x8x32xf32> to vector<8x32xf32>
    %c0_2 = arith.constant 0 : index
    %c0_3 = arith.constant 0 : index
    %c0_4 = arith.constant 0 : index
    %2 = vector.load %arg3[%c0_2, %c0_3, %c0_4] : memref<1x8x32xf32, #tpu.memory_space<vmem>>, vector<1x8x32xf32>
    %3 = vector.shape_cast %2 : vector<1x8x32xf32> to vector<8x32xf32>
    %c0_5 = arith.constant 0 : index
    %c0_6 = arith.constant 0 : index
    %c0_7 = arith.constant 0 : index
    %4 = vector.load %arg4[%c0_5, %c0_6, %c0_7] : memref<1x1x8xf32, #tpu.memory_space<vmem>>, vector<1x1x8xf32>
    %5 = vector.shape_cast %4 : vector<1x1x8xf32> to vector<1x8xf32>
    %c0_8 = arith.constant 0 : index
    %c0_9 = arith.constant 0 : index
    %c0_10 = arith.constant 0 : index
    %6 = vector.load %arg5[%c0_8, %c0_9, %c0_10] : memref<1x32x8xbf16, #tpu.memory_space<vmem>>, vector<1x32x8xbf16>
    %7 = vector.shape_cast %6 : vector<1x32x8xbf16> to vector<32x8xbf16>
    %c0_11 = arith.constant 0 : index
    %c0_12 = arith.constant 0 : index
    %c0_13 = arith.constant 0 : index
    %8 = vector.load %arg6[%c0_11, %c0_12, %c0_13] : memref<1x1x8xf32, #tpu.memory_space<vmem>>, vector<1x1x8xf32>
    %9 = vector.shape_cast %8 : vector<1x1x8xf32> to vector<1x8xf32>
    %c0_14 = arith.constant 0 : index
    %c0_15 = arith.constant 0 : index
    %c0_16 = arith.constant 0 : index
    %10 = vector.load %arg7[%c0_14, %c0_15, %c0_16] : memref<1x32x8xbf16, #tpu.memory_space<vmem>>, vector<1x32x8xbf16>
    %11 = vector.shape_cast %10 : vector<1x32x8xbf16> to vector<32x8xbf16>
    %c0_17 = arith.constant 0 : index
    %c0_18 = arith.constant 0 : index
    %c0_19 = arith.constant 0 : index
    %12 = vector.load %arg8[%c0_17, %c0_18, %c0_19] : memref<1x1x8xf32, #tpu.memory_space<vmem>>, vector<1x1x8xf32>
    %13 = vector.shape_cast %12 : vector<1x1x8xf32> to vector<1x8xf32>
    %c0_20 = arith.constant 0 : index
    %c0_21 = arith.constant 0 : index
    %c0_22 = arith.constant 0 : index
    %14 = vector.load %arg9[%c0_20, %c0_21, %c0_22] : memref<1x32x8xbf16, #tpu.memory_space<vmem>>, vector<1x32x8xbf16>
    %15 = vector.shape_cast %14 : vector<1x32x8xbf16> to vector<32x8xbf16>
    %c0_23 = arith.constant 0 : index
    %c0_24 = arith.constant 0 : index
    %c0_25 = arith.constant 0 : index
    %16 = vector.load %arg10[%c0_23, %c0_24, %c0_25] : memref<1x1x8xf32, #tpu.memory_space<vmem>>, vector<1x1x8xf32>
    %17 = vector.shape_cast %16 : vector<1x1x8xf32> to vector<1x8xf32>
    %c0_26 = arith.constant 0 : index
    %c0_27 = arith.constant 0 : index
    %c0_28 = arith.constant 0 : index
    %18 = vector.load %arg11[%c0_26, %c0_27, %c0_28] : memref<1x8x32xbf16, #tpu.memory_space<vmem>>, vector<1x8x32xbf16>
    %19 = vector.shape_cast %18 : vector<1x8x32xbf16> to vector<8x32xbf16>
    %c0_29 = arith.constant 0 : index
    %c0_30 = arith.constant 0 : index
    %20 = vector.load %arg12[%c0_29, %c0_30] : memref<1x32xf32, #tpu.memory_space<vmem>>, vector<1x32xf32>
    %c0_31 = arith.constant 0 : index
    %c0_32 = arith.constant 0 : index
    %21 = vector.load %arg13[%c0_31, %c0_32] : memref<1x32xf32, #tpu.memory_space<vmem>>, vector<1x32xf32>
    %c0_33 = arith.constant 0 : index
    %c0_34 = arith.constant 0 : index
    %22 = vector.load %arg14[%c0_33, %c0_34] : memref<1x32xf32, #tpu.memory_space<vmem>>, vector<1x32xf32>
    %c0_i32 = arith.constant 0 : i32
    %23 = arith.cmpi eq, %arg1, %c0_i32 : i32
    %24 = arith.extui %23 : i1 to i32
    %c0_i32_35 = arith.constant 0 : i32
    %25 = arith.cmpi ne, %24, %c0_i32_35 : i32
    scf.if %25 {
      %cst_48 = arith.constant 0.000000e+00 : f32
      %63 = vector.broadcast %cst_48 : f32 to vector<8x32xf32>
      %c0_49 = arith.constant 0 : index
      %c0_50 = arith.constant 0 : index
      %64 = vector.load %arg16[%c0_49, %c0_50] : memref<8x32xf32, #tpu.memory_space<vmem>>, vector<8x32xf32>
      tpu.vector_store %arg16[%c0_49, %c0_50], %63 {strides = array<i32>} : memref<8x32xf32, #tpu.memory_space<vmem>>, vector<8x32xf32>,
    } else {
    }
    %26 = arith.truncf %1 : vector<8x32xf32> to vector<8x32xbf16>
    %27 = arith.truncf %3 : vector<8x32xf32> to vector<8x32xbf16>
    %cst = arith.constant dense<0.000000e+00> : vector<8x8xf32>
    %28 = tpu.matmul %26, %7, %cst {dimension_numbers = #tpu.dot_dimension_numbers<[1], [0], [0], [1], [0, 0, 1, 1], [], []>} : vector<8x32xbf16>, vector<32x8xbf16>, vector<8x8xf32> -> vector<8x8xf32>
    %29 = vector.broadcast %9 : vector<1x8xf32> to vector<8x8xf32>
    %30 = arith.addf %28, %29 : vector<8x8xf32>
    %cst_36 = arith.constant dense<0.000000e+00> : vector<8x8xf32>
    %31 = tpu.matmul %27, %11, %cst_36 {dimension_numbers = #tpu.dot_dimension_numbers<[1], [0], [0], [1], [0, 0, 1, 1], [], []>} : vector<8x32xbf16>, vector<32x8xbf16>, vector<8x8xf32> -> vector<8x8xf32>
    %32 = vector.broadcast %13 : vector<1x8xf32> to vector<8x8xf32>
    %33 = arith.addf %31, %32 : vector<8x8xf32>
    %cst_37 = arith.constant dense<0.000000e+00> : vector<8x8xf32>
    %34 = tpu.matmul %27, %15, %cst_37 {dimension_numbers = #tpu.dot_dimension_numbers<[1], [0], [0], [1], [0, 0, 1, 1], [], []>} : vector<8x32xbf16>, vector<32x8xbf16>, vector<8x8xf32> -> vector<8x8xf32>
    %35 = vector.broadcast %17 : vector<1x8xf32> to vector<8x8xf32>
    %36 = arith.addf %34, %35 : vector<8x8xf32>
    %37 = arith.truncf %30 : vector<8x8xf32> to vector<8x8xbf16>
    %38 = arith.truncf %33 : vector<8x8xf32> to vector<8x8xbf16>
    %cst_38 = arith.constant dense<0.000000e+00> : vector<8x8xf32>
    %39 = tpu.matmul %37, %38, %cst_38 {dimension_numbers = #tpu.dot_dimension_numbers<[1], [1], [0], [0], [0, 0, 1, 0], [], []>} : vector<8x8xbf16>, vector<8x8xbf16>, vector<8x8xf32> -> vector<8x8xf32>
    %40 = vector.broadcast %5 : vector<1x8xf32> to vector<8x8xf32>
    %41 = arith.addf %39, %40 : vector<8x8xf32>
    %cst_39 = arith.constant dense<0xFF800000> : vector<8xf32>
    %42 = vector.multi_reduction <maximumf>, %41, %cst_39 [1] : vector<8x8xf32> to vector<8xf32>
    %43 = vector.shape_cast %42 : vector<8xf32> to vector<8x1xf32>
    %44 = vector.broadcast %43 : vector<8x1xf32> to vector<8x8xf32>
    %45 = arith.subf %41, %44 : vector<8x8xf32>
    %46 = math.exp %45 : vector<8x8xf32>
    %cst_40 = arith.constant dense<0.000000e+00> : vector<8xf32>
    %47 = vector.multi_reduction <add>, %46, %cst_40 [1] : vector<8x8xf32> to vector<8xf32>
    %48 = vector.shape_cast %47 : vector<8xf32> to vector<8x1xf32>
    %49 = tpu.reciprocal %48 {approx = true} : vector<8x1xf32> -> vector<8x1xf32>
    %50 = arith.truncf %46 : vector<8x8xf32> to vector<8x8xbf16>
    %51 = arith.truncf %36 : vector<8x8xf32> to vector<8x8xbf16>
    %cst_41 = arith.constant dense<0.000000e+00> : vector<8x8xf32>
    %52 = tpu.matmul %50, %51, %cst_41 {dimension_numbers = #tpu.dot_dimension_numbers<[1], [0], [0], [1], [0, 0, 1, 1], [], []>} : vector<8x8xbf16>, vector<8x8xbf16>, vector<8x8xf32> -> vector<8x8xf32>
    %53 = vector.broadcast %49 : vector<8x1xf32> to vector<8x8xf32>
    %54 = arith.mulf %52, %53 : vector<8x8xf32>
    %c0_42 = arith.constant 0 : index
    %c0_43 = arith.constant 0 : index
    %55 = vector.load %arg16[%c0_42, %c0_43] : memref<8x32xf32, #tpu.memory_space<vmem>>, vector<8x32xf32>
    %56 = arith.truncf %54 : vector<8x8xf32> to vector<8x8xbf16>
    %cst_44 = arith.constant dense<0.000000e+00> : vector<8x32xf32>
    %57 = tpu.matmul %56, %19, %cst_44 {dimension_numbers = #tpu.dot_dimension_numbers<[1], [0], [0], [1], [0, 0, 1, 1], [], []>} : vector<8x8xbf16>, vector<8x32xbf16>, vector<8x32xf32> -> vector<8x32xf32>
    %58 = arith.addf %55, %57 : vector<8x32xf32>
    %c0_45 = arith.constant 0 : index
    %c0_46 = arith.constant 0 : index
    %59 = vector.load %arg16[%c0_45, %c0_46] : memref<8x32xf32, #tpu.memory_space<vmem>>, vector<8x32xf32>
    tpu.vector_store %arg16[%c0_45, %c0_46], %58 {strides = array<i32>} : memref<8x32xf32, #tpu.memory_space<vmem>>, vector<8x32xf32>,
    %c3_i32 = arith.constant 3 : i32
    %60 = arith.cmpi eq, %arg1, %c3_i32 : i32
    %61 = arith.extui %60 : i1 to i32
    %c0_i32_47 = arith.constant 0 : i32
    %62 = arith.cmpi ne, %61, %c0_i32_47 : i32
    scf.if %62 {
      %c0_48 = arith.constant 0 : index
      %c0_49 = arith.constant 0 : index
      %63 = vector.load %arg16[%c0_48, %c0_49] : memref<8x32xf32, #tpu.memory_space<vmem>>, vector<8x32xf32>
      %64 = arith.addf %1, %63 : vector<8x32xf32>
      %65 = vector.broadcast %20 : vector<1x32xf32> to vector<8x32xf32>
      %66 = arith.addf %64, %65 : vector<8x32xf32>
      %cst_50 = arith.constant dense<0.000000e+00> : vector<8xf32>
      %67 = vector.multi_reduction <add>, %66, %cst_50 [1] : vector<8x32xf32> to vector<8xf32>
      %68 = vector.shape_cast %67 : vector<8xf32> to vector<8x1xf32>
      %cst_51 = arith.constant 3.200000e+01 : f32
      %69 = vector.broadcast %cst_51 : f32 to vector<8x1xf32>
      %70 = arith.divf %68, %69 : vector<8x1xf32>
      %71 = vector.broadcast %70 : vector<8x1xf32> to vector<8x32xf32>
      %72 = arith.subf %66, %71 : vector<8x32xf32>
      %73 = vector.broadcast %70 : vector<8x1xf32> to vector<8x32xf32>
      %74 = arith.subf %66, %73 : vector<8x32xf32>
      %75 = arith.mulf %72, %74 : vector<8x32xf32>
      %cst_52 = arith.constant dense<0.000000e+00> : vector<8xf32>
      %76 = vector.multi_reduction <add>, %75, %cst_52 [1] : vector<8x32xf32> to vector<8xf32>
      %77 = vector.shape_cast %76 : vector<8xf32> to vector<8x1xf32>
      %cst_53 = arith.constant 3.200000e+01 : f32
      %78 = vector.broadcast %cst_53 : f32 to vector<8x1xf32>
      %79 = arith.divf %77, %78 : vector<8x1xf32>
      %80 = vector.broadcast %70 : vector<8x1xf32> to vector<8x32xf32>
      %81 = arith.subf %66, %80 : vector<8x32xf32>
      %cst_54 = arith.constant 9.99999974E-6 : f32
      %82 = vector.broadcast %cst_54 : f32 to vector<8x1xf32>
      %83 = arith.addf %79, %82 : vector<8x1xf32>
      %84 = math.rsqrt %83 : vector<8x1xf32>
      %85 = vector.broadcast %84 : vector<8x1xf32> to vector<8x32xf32>
      %86 = arith.mulf %81, %85 : vector<8x32xf32>
      %87 = vector.broadcast %21 : vector<1x32xf32> to vector<8x32xf32>
      %88 = arith.mulf %86, %87 : vector<8x32xf32>
      %89 = vector.broadcast %22 : vector<1x32xf32> to vector<8x32xf32>
      %90 = arith.addf %88, %89 : vector<8x32xf32>
      %c0_55 = arith.constant 0 : index
      %c0_56 = arith.constant 0 : index
      %c0_57 = arith.constant 0 : index
      %91 = vector.load %arg15[%c0_55, %c0_56, %c0_57] : memref<1x8x32xf32, #tpu.memory_space<vmem>>, vector<1x8x32xf32>
      %92 = vector.shape_cast %91 : vector<1x8x32xf32> to vector<8x32xf32>
      %93 = vector.shape_cast %90 : vector<8x32xf32> to vector<1x8x32xf32>
      tpu.vector_store %arg15[%c0_55, %c0_56, %c0_57], %93 {strides = array<i32>} : memref<1x8x32xf32, #tpu.memory_space<vmem>>, vector<1x8x32xf32>,
    } else {
    }
    return
  }
  func.func @transform_0(%arg0: i32, %arg1: i32) -> (i32, i32, i32) {
    %c0_i32 = arith.constant 0 : i32
    %c0_i32_0 = arith.constant 0 : i32
    %c0_i32_1 = arith.constant 0 : i32
    return %arg0, %c0_i32, %c0_i32_0 : i32, i32, i32
  }
  func.func @transform_1(%arg0: i32, %arg1: i32) -> (i32, i32, i32) {
    %c0_i32 = arith.constant 0 : i32
    %c0_i32_0 = arith.constant 0 : i32
    %c0_i32_1 = arith.constant 0 : i32
    return %arg0, %c0_i32, %c0_i32_0 : i32, i32, i32
  }
  func.func @transform_2(%arg0: i32, %arg1: i32) -> (i32, i32, i32) {
    %c0_i32 = arith.constant 0 : i32
    %c0_i32_0 = arith.constant 0 : i32
    %c0_i32_1 = arith.constant 0 : i32
    return %arg0, %c0_i32, %c0_i32_0 : i32, i32, i32
  }
  func.func @transform_3(%arg0: i32, %arg1: i32) -> (i32, i32, i32) {
    %c0_i32 = arith.constant 0 : i32
    %c0_i32_0 = arith.constant 0 : i32
    %c0_i32_1 = arith.constant 0 : i32
    return %arg1, %c0_i32, %c0_i32_0 : i32, i32, i32
  }
  func.func @transform_4(%arg0: i32, %arg1: i32) -> (i32, i32, i32) {
    %c0_i32 = arith.constant 0 : i32
    %c0_i32_0 = arith.constant 0 : i32
    %c0_i32_1 = arith.constant 0 : i32
    return %arg1, %c0_i32, %c0_i32_0 : i32, i32, i32
  }
  func.func @transform_5(%arg0: i32, %arg1: i32) -> (i32, i32, i32) {
    %c0_i32 = arith.constant 0 : i32
    %c0_i32_0 = arith.constant 0 : i32
    %c0_i32_1 = arith.constant 0 : i32
    return %arg1, %c0_i32, %c0_i32_0 : i32, i32, i32
  }
  func.func @transform_6(%arg0: i32, %arg1: i32) -> (i32, i32, i32) {
    %c0_i32 = arith.constant 0 : i32
    %c0_i32_0 = arith.constant 0 : i32
    %c0_i32_1 = arith.constant 0 : i32
    return %arg1, %c0_i32, %c0_i32_0 : i32, i32, i32
  }
  func.func @transform_7(%arg0: i32, %arg1: i32) -> (i32, i32, i32) {
    %c0_i32 = arith.constant 0 : i32
    %c0_i32_0 = arith.constant 0 : i32
    %c0_i32_1 = arith.constant 0 : i32
    return %arg1, %c0_i32, %c0_i32_0 : i32, i32, i32
  }
  func.func @transform_8(%arg0: i32, %arg1: i32) -> (i32, i32, i32) {
    %c0_i32 = arith.constant 0 : i32
    %c0_i32_0 = arith.constant 0 : i32
    %c0_i32_1 = arith.constant 0 : i32
    return %arg1, %c0_i32, %c0_i32_0 : i32, i32, i32
  }
  func.func @transform_9(%arg0: i32, %arg1: i32) -> (i32, i32, i32) {
    %c0_i32 = arith.constant 0 : i32
    %c0_i32_0 = arith.constant 0 : i32
    %c0_i32_1 = arith.constant 0 : i32
    return %arg1, %c0_i32, %c0_i32_0 : i32, i32, i32
  }
  func.func @transform_10(%arg0: i32, %arg1: i32) -> (i32, i32) {
    %c0_i32 = arith.constant 0 : i32
    %c0_i32_0 = arith.constant 0 : i32
    %c0_i32_1 = arith.constant 0 : i32
    return %c0_i32, %c0_i32_0 : i32, i32
  }
  func.func @transform_11(%arg0: i32, %arg1: i32) -> (i32, i32) {
    %c0_i32 = arith.constant 0 : i32
    %c0_i32_0 = arith.constant 0 : i32
    %c0_i32_1 = arith.constant 0 : i32
    return %c0_i32, %c0_i32_0 : i32, i32
  }
  func.func @transform_12(%arg0: i32, %arg1: i32) -> (i32, i32) {
    %c0_i32 = arith.constant 0 : i32
    %c0_i32_0 = arith.constant 0 : i32
    %c0_i32_1 = arith.constant 0 : i32
    return %c0_i32, %c0_i32_0 : i32, i32
  }
  func.func @transform_13(%arg0: i32, %arg1: i32) -> (i32, i32, i32) {
    %c0_i32 = arith.constant 0 : i32
    %c0_i32_0 = arith.constant 0 : i32
    %c0_i32_1 = arith.constant 0 : i32
    return %arg0, %c0_i32, %c0_i32_0 : i32, i32, i32
  }
}

module attributes {stable_mosaic.version = 11 : i64} {
  func.func @_ff_ln_kernel(%arg0: i32, %arg1: memref<16x32xf32, #tpu.memory_space<vmem>>, %arg2: memref<32x128xbf16, #tpu.memory_space<vmem>>, %arg3: memref<1x128xf32, #tpu.memory_space<vmem>>, %arg4: memref<128x32xbf16, #tpu.memory_space<vmem>>, %arg5: memref<1x32xf32, #tpu.memory_space<vmem>>, %arg6: memref<1x32xf32, #tpu.memory_space<vmem>>, %arg7: memref<1x32xf32, #tpu.memory_space<vmem>>, %arg8: memref<16x32xf32, #tpu.memory_space<vmem>>) attributes {dimension_semantics = [#tpu.dimension_semantics<parallel>], iteration_bounds = array<i64: 1>, scalar_prefetch = 0 : i64, scratch_operands = 0 : i64, tpu.core_type = #tpu.core_type<tc>, window_params = [{transform_indices = @transform_0, window_bounds = array<i64: 16, 32>}, {pipeline_mode = #tpu.pipeline_mode<synchronous>, transform_indices = @transform_1, window_bounds = array<i64: 32, 128>}, {pipeline_mode = #tpu.pipeline_mode<synchronous>, transform_indices = @transform_2, window_bounds = array<i64: 1, 128>}, {pipeline_mode = #tpu.pipeline_mode<synchronous>, transform_indices = @transform_3, window_bounds = array<i64: 128, 32>}, {pipeline_mode = #tpu.pipeline_mode<synchronous>, transform_indices = @transform_4, window_bounds = array<i64: 1, 32>}, {pipeline_mode = #tpu.pipeline_mode<synchronous>, transform_indices = @transform_5, window_bounds = array<i64: 1, 32>}, {pipeline_mode = #tpu.pipeline_mode<synchronous>, transform_indices = @transform_6, window_bounds = array<i64: 1, 32>}, {transform_indices = @transform_7, window_bounds = array<i64: 16, 32>}]} {
    %c0 = arith.constant 0 : index
    %c0_0 = arith.constant 0 : index
    %0 = vector.load %arg1[%c0, %c0_0] : memref<16x32xf32, #tpu.memory_space<vmem>>, vector<16x32xf32>
    %1 = arith.truncf %0 : vector<16x32xf32> to vector<16x32xbf16>
    %c0_1 = arith.constant 0 : index
    %c0_2 = arith.constant 0 : index
    %2 = vector.load %arg2[%c0_1, %c0_2] : memref<32x128xbf16, #tpu.memory_space<vmem>>, vector<32x128xbf16>
    %cst = arith.constant dense<0.000000e+00> : vector<16x128xf32>
    %3 = tpu.matmul %1, %2, %cst {dimension_numbers = #tpu.dot_dimension_numbers<[1], [0], [0], [1], [0, 0, 1, 1], [], []>} : vector<16x32xbf16>, vector<32x128xbf16>, vector<16x128xf32> -> vector<16x128xf32>
    %c0_3 = arith.constant 0 : index
    %c0_4 = arith.constant 0 : index
    %4 = vector.load %arg3[%c0_3, %c0_4] : memref<1x128xf32, #tpu.memory_space<vmem>>, vector<1x128xf32>
    %5 = vector.broadcast %4 : vector<1x128xf32> to vector<16x128xf32>
    %6 = arith.addf %3, %5 : vector<16x128xf32>
    %cst_5 = arith.constant 0.000000e+00 : f32
    %7 = vector.broadcast %cst_5 : f32 to vector<16x128xf32>
    %8 = arith.maximumf %6, %7 : vector<16x128xf32>
    %9 = arith.truncf %8 : vector<16x128xf32> to vector<16x128xbf16>
    %c0_6 = arith.constant 0 : index
    %c0_7 = arith.constant 0 : index
    %10 = vector.load %arg4[%c0_6, %c0_7] : memref<128x32xbf16, #tpu.memory_space<vmem>>, vector<128x32xbf16>
    %cst_8 = arith.constant dense<0.000000e+00> : vector<16x32xf32>
    %11 = tpu.matmul %9, %10, %cst_8 {dimension_numbers = #tpu.dot_dimension_numbers<[1], [0], [0], [1], [0, 0, 1, 1], [], []>} : vector<16x128xbf16>, vector<128x32xbf16>, vector<16x32xf32> -> vector<16x32xf32>
    %c0_9 = arith.constant 0 : index
    %c0_10 = arith.constant 0 : index
    %12 = vector.load %arg5[%c0_9, %c0_10] : memref<1x32xf32, #tpu.memory_space<vmem>>, vector<1x32xf32>
    %13 = vector.broadcast %12 : vector<1x32xf32> to vector<16x32xf32>
    %14 = arith.addf %11, %13 : vector<16x32xf32>
    %15 = arith.addf %0, %14 : vector<16x32xf32>
    %cst_11 = arith.constant dense<0.000000e+00> : vector<16xf32>
    %16 = vector.multi_reduction <add>, %15, %cst_11 [1] : vector<16x32xf32> to vector<16xf32>
    %17 = vector.shape_cast %16 : vector<16xf32> to vector<16x1xf32>
    %cst_12 = arith.constant 3.200000e+01 : f32
    %18 = vector.broadcast %cst_12 : f32 to vector<16x1xf32>
    %19 = arith.divf %17, %18 : vector<16x1xf32>
    %20 = vector.broadcast %19 : vector<16x1xf32> to vector<16x32xf32>
    %21 = arith.subf %15, %20 : vector<16x32xf32>
    %22 = vector.broadcast %19 : vector<16x1xf32> to vector<16x32xf32>
    %23 = arith.subf %15, %22 : vector<16x32xf32>
    %24 = arith.mulf %21, %23 : vector<16x32xf32>
    %cst_13 = arith.constant dense<0.000000e+00> : vector<16xf32>
    %25 = vector.multi_reduction <add>, %24, %cst_13 [1] : vector<16x32xf32> to vector<16xf32>
    %26 = vector.shape_cast %25 : vector<16xf32> to vector<16x1xf32>
    %cst_14 = arith.constant 3.200000e+01 : f32
    %27 = vector.broadcast %cst_14 : f32 to vector<16x1xf32>
    %28 = arith.divf %26, %27 : vector<16x1xf32>
    %29 = vector.broadcast %19 : vector<16x1xf32> to vector<16x32xf32>
    %30 = arith.subf %15, %29 : vector<16x32xf32>
    %cst_15 = arith.constant 9.99999974E-6 : f32
    %31 = vector.broadcast %cst_15 : f32 to vector<16x1xf32>
    %32 = arith.addf %28, %31 : vector<16x1xf32>
    %33 = math.rsqrt %32 : vector<16x1xf32>
    %34 = vector.broadcast %33 : vector<16x1xf32> to vector<16x32xf32>
    %35 = arith.mulf %30, %34 : vector<16x32xf32>
    %c0_16 = arith.constant 0 : index
    %c0_17 = arith.constant 0 : index
    %36 = vector.load %arg6[%c0_16, %c0_17] : memref<1x32xf32, #tpu.memory_space<vmem>>, vector<1x32xf32>
    %37 = vector.broadcast %36 : vector<1x32xf32> to vector<16x32xf32>
    %38 = arith.mulf %35, %37 : vector<16x32xf32>
    %c0_18 = arith.constant 0 : index
    %c0_19 = arith.constant 0 : index
    %39 = vector.load %arg7[%c0_18, %c0_19] : memref<1x32xf32, #tpu.memory_space<vmem>>, vector<1x32xf32>
    %40 = vector.broadcast %39 : vector<1x32xf32> to vector<16x32xf32>
    %41 = arith.addf %38, %40 : vector<16x32xf32>
    %c0_20 = arith.constant 0 : index
    %c0_21 = arith.constant 0 : index
    %42 = vector.load %arg8[%c0_20, %c0_21] : memref<16x32xf32, #tpu.memory_space<vmem>>, vector<16x32xf32>
    tpu.vector_store %arg8[%c0_20, %c0_21], %41 {strides = array<i32>} : memref<16x32xf32, #tpu.memory_space<vmem>>, vector<16x32xf32>,
    return
  }
  func.func @transform_0(%arg0: i32) -> (i32, i32) {
    %c0_i32 = arith.constant 0 : i32
    %c0_i32_0 = arith.constant 0 : i32
    return %arg0, %c0_i32 : i32, i32
  }
  func.func @transform_1(%arg0: i32) -> (i32, i32) {
    %c0_i32 = arith.constant 0 : i32
    %c0_i32_0 = arith.constant 0 : i32
    %c0_i32_1 = arith.constant 0 : i32
    return %c0_i32, %c0_i32_0 : i32, i32
  }
  func.func @transform_2(%arg0: i32) -> (i32, i32) {
    %c0_i32 = arith.constant 0 : i32
    %c0_i32_0 = arith.constant 0 : i32
    %c0_i32_1 = arith.constant 0 : i32
    return %c0_i32, %c0_i32_0 : i32, i32
  }
  func.func @transform_3(%arg0: i32) -> (i32, i32) {
    %c0_i32 = arith.constant 0 : i32
    %c0_i32_0 = arith.constant 0 : i32
    %c0_i32_1 = arith.constant 0 : i32
    return %c0_i32, %c0_i32_0 : i32, i32
  }
  func.func @transform_4(%arg0: i32) -> (i32, i32) {
    %c0_i32 = arith.constant 0 : i32
    %c0_i32_0 = arith.constant 0 : i32
    %c0_i32_1 = arith.constant 0 : i32
    return %c0_i32, %c0_i32_0 : i32, i32
  }
  func.func @transform_5(%arg0: i32) -> (i32, i32) {
    %c0_i32 = arith.constant 0 : i32
    %c0_i32_0 = arith.constant 0 : i32
    %c0_i32_1 = arith.constant 0 : i32
    return %c0_i32, %c0_i32_0 : i32, i32
  }
  func.func @transform_6(%arg0: i32) -> (i32, i32) {
    %c0_i32 = arith.constant 0 : i32
    %c0_i32_0 = arith.constant 0 : i32
    %c0_i32_1 = arith.constant 0 : i32
    return %c0_i32, %c0_i32_0 : i32, i32
  }
  func.func @transform_7(%arg0: i32) -> (i32, i32) {
    %c0_i32 = arith.constant 0 : i32
    %c0_i32_0 = arith.constant 0 : i32
    return %arg0, %c0_i32 : i32, i32
  }
}

</mosaic_0001>

<bundles_post_ra>
// kernel: decoder_layer.5
= control target key start
LH: loop header
LB: loop body
LE: loop exit
PB: predicated region body
PF: predicated region fallthrough
CT: control target
= control target key end

     0   :  { %s432_s0 = inlined_call_operand.vmem [shape: f32[16,32], index: 0, kind: input, shape index: {}]   ;;  %s433_s1 = inlined_call_operand.vmem [shape: bf16[32,128], index: 1, kind: input, shape index: {}]   ;;  %s434_s2 = inlined_call_operand.vmem [shape: f32[1,128], index: 2, kind: input, shape index: {}]   ;;  %s435_s3 = inlined_call_operand.vmem [shape: bf16[128,32], index: 3, kind: input, shape index: {}]   ;;  %s436_s4 = inlined_call_operand.vmem [shape: f32[1,32], index: 4, kind: input, shape index: {}]   ;;  %s437_s5 = inlined_call_operand.vmem [shape: f32[1,32], index: 5, kind: input, shape index: {}]   ;;  %s438_s6 = inlined_call_operand.vmem [shape: f32[1,32], index: 6, kind: input, shape index: {}]   ;;  %s439_s7 = inlined_call_operand.hbm [shape: f32[16,32], index: 7, kind: output, shape index: {}]  }
   0x1   :  { %v281_v0 = vld [vmem:[%s433_s1 + $0x8] sm:$0xff]  ;;  %v280_v1 = vld [vmem:[%s433_s1] sm:$0xff]  ;;  %v289_v2 = vld [vmem:[%s435_s3 + $0x38] sm:$0xff] }
   0x2   :  { %61 = vmatpush.bf16.msra.mxu0 %v281_v0  ;;  %v28_v3 = vld [vmem:[%s432_s0] sm:$0xff]  ;;  %v29_v4 = vld [vmem:[%s432_s0 + $0x8] sm:$0xff]  ;;  %140 = vmatpush.bf16.msra.mxu1 %v289_v2  ;;  %v288_v5 = vld [vmem:[%s435_s3 + $0x30] sm:$0xff] }
   0x3   :  { %12 = vsyncpa [#allocation3], 0  ;;  %v30_v6 = vpack.c.bf16 %v29_v4, %v28_v3  ;;  %vm51_vm0 = vcmask 261120   ;;  %v287_v7 = vld [vmem:[%s435_s3 + $0x28] sm:$0xff]  ;;  %v286_v8 = vld [vmem:[%s435_s3 + $0x20] sm:$0xff]  ;;  %v330_v30 = vmov 32.0  }
   0x4   :  { %v285_v9 = vld [vmem:[%s435_s3 + $0x18] sm:$0xff]  ;;  %v284_v10 = vld [vmem:[%s435_s3 + $0x10] sm:$0xff]  ;;  %v283_v11 = vld [vmem:[%s435_s3 + $0x8] sm:$0xff]  ;;  %298 = vrcp.f32 %v330_v30  ;;  %s227_s8 = sshll.u32 %s439_s7, 4  ;;  %s333_s9 = smov 8   ;;  %s228_s8 = int_to_ptr.hbm [resolvable:$true] %s227_s8 }
   0x5   :  { %v282_v12 = vld [vmem:[%s435_s3] sm:$0xff] }
   0x6   :  { %62 = vmatpush.bf16.msra.mxu0 %v280_v1  ;;  %141 = vmatpush.bf16.msra.mxu1 %v288_v5  ;;  %v294_v14 = vld [vmem:[%s434_s2] ss:$0 sm:$0xff] }
   0x7   :  { %v295_v21 = vld [vmem:[%s436_s4] ss:$0 sm:$0xff] }
   0x8   :  { %v296_v61 = vld [vmem:[%s437_s5] ss:$0 sm:$0xff]  ;;  %s331_s5 = smov [#allocation2]  }
   0x9   :  { %247 = vmatmul.msk.bf16.vlgmr.msra.gmra.mxu0 %vm51_vm0, %v30_v6  ;;  %v297_v1 = vld [vmem:[%s438_s6] ss:$0 sm:$0xff]  ;;  %s225_s28 = sshll.u32 %s331_s5, 4  ;;  %s332_s6 = smov 128   ;;  %s226_s28 = int_to_ptr.vmem [resolvable:$true] %s225_s28 }
   0xa   :  { %142 = vmatpush.bf16.msra.mxu1 %v287_v7  ;;  %v299_v31 = vpop.eup %298 }
   0xb   :  { %v163_v32 = vmul.f32 32.0, %v299_v31  ;;  %vm167_vm1 = vweird.f32 %v299_v31 }
   0xd   :  { %v164_v33 = vsub.f32 1.0, %v163_v32 }
   0xe   :  { %143 = vmatpush.bf16.msra.mxu1 %v286_v8 }
   0xf   :  { %v165_v34 = vmul.f32 %v299_v31, %v164_v33 }
  0x11   :  { %v166_v35 = vadd.f32 %v299_v31, %v165_v34 }
  0x12   :  { %144 = vmatpush.bf16.msra.mxu1 %v285_v9 }
  0x13   :  { %v168_v36 = vsel %vm167_vm1, %v299_v31, %v166_v35 }
  0x16   :  { %145 = vmatpush.bf16.msra.mxu1 %v284_v10 }
  0x1a   :  { %146 = vmatpush.bf16.msra.mxu1 %v283_v11 }
  0x1e   :  { %147 = vmatpush.bf16.msra.mxu1 %v282_v12 }
  0x86   :  { %v64_v13 = vpop.f32.mrf.mxu0 }
  0x87   :  { %v65_v15 = vadd.f32 %v294_v14, %v64_v13 }
  0x89   :  { %v69_v18 = vmax.f32 %v65_v15, 0.0 }
  0x8e   :  { %v66_v16 = vpop.f32.mrf.mxu0 }
  0x8f   :  { %v67_v17 = vadd.f32 %v294_v14, %v66_v16 }
  0x91   :  { %v70_v19 = vmax.f32 %v67_v17, 0.0 }
  0x93   :  { %v71_v20 = vpack.c.bf16 %v70_v19, %v69_v18 }
  0x95   :  { %148 = vmatmul.bf16.vlgmr.msra.gmra.mxu1 %v71_v20 }
 0x112   :  { %v149_v22 = vpop.f32.mrf.mxu1 }
 0x113   :  { %v150_v23 = vadd.f32 %v295_v21, %v149_v22 }
 0x115   :  { %v154_v24 = vadd.f32 %v150_v23, %v28_v3 }
 0x117   :  { %v156_v25 = vsel %vm51_vm0, %v154_v24, 0.0 }
 0x118   :  { %157 = vadd.xlane.f32.xlu0 %v156_v25 }
 0x11a   :  { %v151_v26 = vpop.f32.mrf.mxu1 }
 0x11b   :  { %v152_v27 = vadd.f32 %v295_v21, %v151_v26 }
 0x11d   :  { %v155_v28 = vadd.f32 %v152_v27, %v29_v4 }
 0x11f   :  { %v159_v29 = vsel %vm51_vm0, %v155_v28, 0.0 }
 0x120   :  { %160 = vadd.xlane.f32.xlu0 %v159_v29 }
 0x18b   :  { %v158_v37 = vpop.xlane.xlu0 %157 }
 0x18c   :  { %v169_v38 = vmul.f32 %v168_v36, %v158_v37 }
 0x18e   :  { %v171_v39 = vsub.f32 %v154_v24, %v169_v38 }
 0x190   :  { %v173_v40 = vmul.f32 %v171_v39, %v171_v39 }
 0x192   :  { %v175_v41 = vsel %vm51_vm0, %v173_v40, 0.0 }
 0x193   :  { %176 = vadd.xlane.f32.xlu1 %v175_v41  ;;  %v161_v42 = vpop.xlane.xlu0 %160 }
 0x194   :  { %v170_v43 = vmul.f32 %v168_v36, %v161_v42 }
 0x196   :  { %v172_v44 = vsub.f32 %v155_v28, %v170_v43 }
 0x198   :  { %v174_v45 = vmul.f32 %v172_v44, %v172_v44 }
 0x19a   :  { %v178_v46 = vsel %vm51_vm0, %v174_v45, 0.0 }
 0x19b   :  { %179 = vadd.xlane.f32.xlu1 %v178_v46 }
 0x206   :  { %v177_v47 = vpop.xlane.xlu1 %176 }
 0x207   :  { %v181_v48 = vmul.f32 %v177_v47, %v168_v36 }
 0x209   :  { %v183_v49 = vadd.f32 1e-05, %v181_v48 }
 0x20b   :  { %300 = vrsqrt.f32 %v183_v49  ;;  %vm191_vm3 = vweird.f32 %v183_v49 }
 0x20e   :  { %v180_v50 = vpop.xlane.xlu1 %179 }
 0x20f   :  { %v182_v51 = vmul.f32 %v180_v50, %v168_v36 }
 0x211   :  { %v301_v52 = vpop.eup %300  ;;  %v184_v53 = vadd.f32 1e-05, %v182_v51 }
 0x212   :  { %v186_v54 = vmul.f32 %v301_v52, %v183_v49  ;;  %vm192_vm2 = vweird.f32 %v301_v52 }
 0x213   :  { %302 = vrsqrt.f32 %v184_v53  ;;  %vm193_vm4 = vmor %vm191_vm3, %vm192_vm2  ;;  %vm201_vm6 = vweird.f32 %v184_v53 }
 0x214   :  { %v187_v55 = vmul.f32 %v301_v52, %v186_v54 }
 0x216   :  { %v188_v56 = vmul.f32 0.5, %v187_v55 }
 0x218   :  { %v189_v57 = vsub.f32 1.5, %v188_v56 }
 0x219   :  { %v303_v58 = vpop.eup %302 }
 0x21a   :  { %v190_v59 = vmul.f32 %v301_v52, %v189_v57  ;;  %v196_v60 = vmul.f32 %v303_v58, %v184_v53  ;;  %vm202_vm5 = vweird.f32 %v303_v58 }
 0x21b   :  { %vm203_vm7 = vmor %vm201_vm6, %vm202_vm5 }
 0x21c   :  { %v194_v62 = vsel %vm193_vm4, %v301_v52, %v190_v59  ;;  %v197_v63 = vmul.f32 %v303_v58, %v196_v60 }
 0x21d   :  { %v205_v0 = vmul.f32 %v194_v62, %v171_v39 }
 0x21e   :  { %v198_v2 = vmul.f32 0.5, %v197_v63 }
 0x21f   :  { %v211_v3 = vmul.f32 %v296_v61, %v205_v0 }
 0x220   :  { %v199_v4 = vsub.f32 1.5, %v198_v2 }
 0x221   :  { %v217_v5 = vadd.f32 %v297_v1, %v211_v3 }
 0x222   :  { %v200_v6 = vmul.f32 %v303_v58, %v199_v4 }
 0x223   :  { %219 = vst.msk [vmem:[#allocation2] sm:$0xff] %vm51_vm0, %v217_v5 }
 0x224   :  { %v204_v7 = vsel %vm203_vm7, %v303_v58, %v200_v6 }
 0x225   :  { %v206_v8 = vmul.f32 %v204_v7, %v172_v44 }
 0x227   :  { %v212_v9 = vmul.f32 %v296_v61, %v206_v8 }
 0x229   :  { %v218_v10 = vadd.f32 %v297_v1, %v212_v9 }
 0x22b   :  { %220 = vst.msk [vmem:[#allocation2 + $0x8] sm:$0xff] %vm51_vm0, %v218_v10 }
 0x22c   :  { %233 = dma.vmem_to_hbm [thread:$0]  %s226_s28, 256, %s228_s8, [#allocation3], %s332_s6, %s332_s6, %s333_s9  }
 0x22d   :  { %328 = dma.done.wait [#allocation3], 256  }
 0x22e   :  { %329 = vsyncadd [#allocation3], 4294967040 }
 0x22f   :  { %238 = vsyncpa [#allocation3], 1 }

// kernel: decoder_layer.3
= control target key start
LH: loop header
LB: loop body
LE: loop exit
PB: predicated region body
PF: predicated region fallthrough
CT: control target
= control target key end

     0   :  { %s1168_s21 = smov 0   ;;  %s1170_s22 = smov 0   ;;  %s1300_s0 = inlined_call_operand.vmem [shape: f32[2,8,32], index: 0, kind: input, shape index: {}]   ;;  %s1301_s1 = inlined_call_operand.vmem [shape: f32[2,1,8], index: 1, kind: input, shape index: {}]   ;;  %s1302_s2 = inlined_call_operand.vmem [shape: bf16[4,32,8], index: 2, kind: input, shape index: {}]   ;;  %s1303_s3 = inlined_call_operand.vmem [shape: f32[4,1,8], index: 3, kind: input, shape index: {}]   ;;  %s1304_s4 = inlined_call_operand.vmem [shape: bf16[4,32,8], index: 4, kind: input, shape index: {}]   ;;  %s1305_s5 = inlined_call_operand.vmem [shape: f32[4,1,8], index: 5, kind: input, shape index: {}]   ;;  %s1306_s6 = inlined_call_operand.vmem [shape: bf16[4,32,8], index: 6, kind: input, shape index: {}]   ;;  %s1307_s7 = inlined_call_operand.vmem [shape: f32[4,1,8], index: 7, kind: input, shape index: {}]   ;;  %s1308_s8 = inlined_call_operand.vmem [shape: bf16[4,8,32], index: 8, kind: input, shape index: {}]   ;;  %s1309_s9 = inlined_call_operand.vmem [shape: f32[1,32], index: 9, kind: input, shape index: {}]   ;;  %s1310_s10 = inlined_call_operand.vmem [shape: f32[1,32], index: 10, kind: input, shape index: {}]   ;;  %s1311_s11 = inlined_call_operand.vmem [shape: f32[1,32], index: 11, kind: input, shape index: {}]   ;;  %s1312_s12 = inlined_call_operand.vmem [shape: f32[2,8,32], index: 12, kind: output, shape index: {}]  }
   0x1   :  { %1313 = sst [smem:[#allocation4_spill]] %s1300_s0  ;;  %s1172_s23 = smov 0  }
   0x2   :  { %1314 = sst [smem:[#allocation5_spill]] %s1301_s1  ;;  %s1174_s24 = smov 0  }
   0x3   :  { %1315 = sst [smem:[#allocation6_spill]] %s1302_s2  ;;  %s1176_s25 = smov 0  }
   0x4   :  { %1316 = sst [smem:[#allocation7_spill]] %s1309_s9 }
   0x5   :  { %1317 = sst [smem:[#allocation8_spill]] %s1310_s10 }
   0x6   :  { %1318 = sst [smem:[#allocation9_spill]] %s1311_s11 }
   0x7 LB: > { %s31_s26 = sadd.s32 1, %s1091_s23  ;;  %s34_s27 = sadd.s32 1, %s1095_s24  ;;  %s1099_s25 = sphi %s1176_s25, %s22_s25   ;;  %s1095_s24 = sphi %s1174_s24, %s1330_s24   ;;  %s1091_s23 = sphi %s1172_s23, %s1329_s23   ;;  %s1087_s22 = sphi %s1170_s22, %s1328_s22   ;;  %s1083_s21 = sphi %s1168_s21, %s1327_s21  }
   0x8   : > { %p32_p0 = scmp.ge.s32.totalorder %s31_s26, 4  ;;  %p958_p1 = scmp.ge.s32.totalorder %s1099_s25, 1 }
   0x9   : > { %p444_p2 = scmp.lt.s32.totalorder %s1099_s25, 9 }
   0xa   : > { %s1332_s26 = smov (%p32_p0, %s31_s26), 0  ;;  %s1334_s27 = smov (!%p32_p0, %s34_s27), %s1095_s24 }
   0xb   : > { %p445_p3 = pnand %p958_p1, %p444_p2  ;;  %p36_p4 = scmp.ge.s32.totalorder %s1334_s27, 2 }
   0xc   : > { %p515_p5 = scmp.lt.s32.totalorder (!%p445_p3), %s1087_s22, 1  ;;  %p522_p6 = scmp.lt.s32.totalorder (!%p445_p3), %s1083_s21, 3 }
   0xd   : > { %s1336_s27 = smov (%p36_p4, %s1334_s27), 0  ;;  %448 = sbr.rel (%p445_p3) target bundleno = 987 (0x3db), region = 68 }
   0xe   : > { %1319 = sst [smem:[#allocation3_spill]] %s1336_s27  ;;  %p968_p7 = scmp.ne.s32.totalorder (!%p445_p3), %s1083_s21, 0 }
   0xf   : > { %s1320_s9 = sld [smem:[#allocation7_spill]] (!%p445_p3) }
  0x10   : > { %s1321_s10 = sld [smem:[#allocation8_spill]] (!%p445_p3) }
  0x11   : > { %s1322_s11 = sld [smem:[#allocation9_spill]] (!%p445_p3) }
  0x12   : > { %s1338_s22 = smov (!%p515_p5, %s1087_s22), 1  ;;  %s1323_s1 = sld [smem:[#allocation5_spill]] }
  0x13   : > { %s1217_s16 = scalar_select %p522_p6, %s1083_s21, 3 }
  0x14   : > { %s959_s17 = sshll.u32 %s1338_s22, 3  ;;  %s1324_s0 = sld [smem:[#allocation4_spill]] }
  0x15   : > { %v1204_v0 = vld [vmem:[%s1320_s9] sm:$0x1]  ;;  %s1002_s13 = sshll.u32 %s1217_s16, 4  ;;  %s1325_s2 = sld [smem:[#allocation6_spill]] }
  0x16   : > { %v1209_v1 = vld [vmem:[%s1321_s10] sm:$0x1]  ;;  %s529_s27 = scalar_lea.vmem %s1303_s3, %s1217_s16  ;;  %s534_s19 = scalar_lea.vmem %s1304_s4, %s1002_s13 }
  0x17   : > { %v1214_v2 = vld [vmem:[%s1322_s11] sm:$0x1]  ;;  %s542_s15 = scalar_lea.vmem %s1306_s6, %s1002_s13  ;;  %s545_s11 = scalar_lea.vmem %s1307_s7, %s1217_s16  ;;  %v1007_v11 = vld [vmem:[%s534_s19] sm:$0xf0]  ;;  %v984_v12 = vld [vmem:[%s534_s19 + $0x8] sm:$0xf] }
  0x18   : > { %s521_s20 = scalar_lea.vmem %s1323_s1, %s1338_s22  ;;  %v561_v9 = vld [vmem:[%s529_s27] sm:$0x1]  ;;  %s1255_s28 = scalar_lea.vmem %s1312_s12, %s959_s17  ;;  %v1008_v13 = vld [vmem:[%s534_s19 + $0x8] sm:$0xf0]  ;;  %v1009_v16 = vld [vmem:[%s542_s15] sm:$0xf0] }
  0x19   : > { %v1226_v3 = vld [vmem:[%s521_s20] sm:$0x1]  ;;  %v993_v17 = vld [vmem:[%s542_s15 + $0x8] sm:$0xf]  ;;  %v1010_v18 = vld [vmem:[%s542_s15 + $0x8] sm:$0xf0] }
  0x1a   : > { %s518_s30 = scalar_lea.vmem %s1324_s0, %s959_s17  ;;  %s537_s0 = scalar_lea.vmem %s1305_s5, %s1217_s16  ;;  %v980_v10 = vld [vmem:[%s534_s19] sm:$0xf] }
  0x1b   : > { %s526_s9 = scalar_lea.vmem %s1325_s2, %s1002_s13  ;;  %v1235_v4 = vld [vmem:[%s518_s30] sm:$0xff]  ;;  %s966_s30 = sshll.u32 %s1217_s16, 2 }
  0x1c   : > { %v971_v5 = vld [vmem:[%s526_s9] sm:$0xf]  ;;  %v1005_v6 = vld [vmem:[%s526_s9] sm:$0xf0]  ;;  %v975_v7 = vld [vmem:[%s526_s9 + $0x8] sm:$0xf]  ;;  %s549_s20 = scalar_lea.vmem %s1308_s8, %s966_s30 }
  0x1d   : > { %v1006_v8 = vld [vmem:[%s526_s9 + $0x8] sm:$0xf0]  ;;  %v566_v14 = vld [vmem:[%s537_s0] sm:$0x1]  ;;  %579 = sbr.rel (%p968_p7) target bundleno = 36 (0x24), region = 72 }
  0x1e   : > { %v989_v15 = vld [vmem:[%s542_s15] sm:$0xf] }
  0x1f   : > { %v571_v19 = vld [vmem:[%s545_s11] sm:$0x1] }
  0x20   : > { %v572_v20 = vld [vmem:[%s549_s20] sm:$0xf] }
  0x22   : > { %vm580_vm0 = vcmask 261120   ;;  %v1101_v21 = vmov 0.0  }
  0x23   : > { %581 = vst.msk [vmem:[#allocation2] sm:$0xff] %vm580_vm0, %v1101_v21 }
  0x24 PF: > { %v976_v22 = vor.u32 %v1006_v8, %v975_v7  ;;  %v985_v23 = vor.u32 %v1008_v13, %v984_v12  ;;  %v972_v24 = vor.u32 %v1005_v6, %v971_v5  ;;  %v981_v25 = vor.u32 %v1007_v11, %v980_v10  ;;  %p999_p8 = scmp.ne.s32.totalorder %s1083_s21, 3 }
  0x25   : > { %v582_v26 = vpack.c.bf16 %v1235_v4, %v1235_v4  ;;  %vm598_vm1 = vcmask 261120   ;;  %v994_v27 = vor.u32 %v1010_v18, %v993_v17  ;;  %v990_v28 = vor.u32 %v1009_v16, %v989_v15 }
  0x26   : > { %608 = vmatpush.bf16.msra.mxu0 %v976_v22  ;;  %636 = vmatpush.bf16.msra.mxu1 %v985_v23  ;;  %v616_v29 = vperm.slane %v566_v14, 0  ;;  %v584_v32 = vperm.slane %v561_v9, 0  ;;  %vm676_vm2 = vcmask 64512   ;;  %v644_v40 = vperm.slane %v571_v19, 0 }
  0x27   : > { %664 = vmatpush.bf16.msra.mxu2 %v994_v27  ;;  %vm717_vm3 = vcmask 1043456   ;;  %v696_v46 = vlaneseq  ;;  %v674_v49 = vperm.slane %v1226_v3, 0 }
  0x28   : > { %v741_v55 = vsel %vm717_vm3, %v572_v20, 0 }
  0x29   : > { %v697_v47 = vshrl.u32 %v696_v46, 7  ;;  %v699_v48 = vand.u32 127, %v696_v46 }
  0x2a   : > { %609 = vmatpush.bf16.msra.mxu0 %v972_v24  ;;  %637 = vmatpush.bf16.msra.mxu1 %v981_v25  ;;  %v735_v8 = vld [vmem:[#allocation2] sm:$0xff] }
  0x2b   : > { %665 = vmatpush.bf16.msra.mxu2 %v990_v28  ;;  %vm700_vm4 = vcmp.gt.s32.totalorder %v699_v48, %v697_v47 }
  0x2d   : > { %977 = vmatmul.msk.bf16.vlgmr.msra.gmra.mxu0 %vm598_vm1, %v582_v26  ;;  %986 = vmatmul.msk.bf16.vlgmr.msra.gmra.mxu1 %vm598_vm1, %v582_v26 }
  0x2e   : > { %995 = vmatmul.msk.bf16.vlgmr.msra.gmra.mxu2 %vm598_vm1, %v582_v26  ;;  %750 = vmatpush.bf16.msrb.mxu1 %v741_v55 }
  0xaa   : > { %v611_v30 = vpop.f32.mrf.mxu0  ;;  %v639_v31 = vpop.f32.mrf.mxu1 }
  0xab   : > { %v640_v33 = vadd.f32 %v639_v31, %v616_v29  ;;  %v612_v35 = vadd.f32 %v611_v30, %v584_v32 }
  0xad   : > { %v672_v34 = vpack.c.bf16 %v640_v33, %v640_v33  ;;  %v671_v39 = vpack.c.bf16 %v612_v35, %v612_v35 }
  0xaf   : > { %v681_v36 = vsel %vm676_vm2, %v672_v34, 0 }
  0xb0   : > { %690 = vmatpush.bf16.xpose.msra.mxu3 %v681_v36 }
  0xb1   : > { %v667_v41 = vpop.f32.mrf.mxu2 }
  0xb2   : > { %v613_v37 = vpop.f32.mrf.mxu0  ;;  %v641_v38 = vpop.f32.mrf.mxu1  ;;  %v668_v42 = vadd.f32 %v667_v41, %v644_v40 }
  0xb4   : > { %v713_v43 = vpack.c.bf16 %v668_v42, %v668_v42 }
  0xb6   : > { %v719_v44 = vsel %vm717_vm3, %v713_v43, 0 }
  0xb7   : > { %996 = vmatmul.msk.bf16.vlgmr.msra.gmra.mxu3 %vm676_vm2, %v671_v39  ;;  %728 = vmatpush.bf16.msrb.mxu0 %v719_v44 }
  0xb9   : > { %v669_v45 = vpop.f32.mrf.mxu2 }
 0x13a   : > { %v692_v50 = vpop.f32.mrf.mxu3 }
 0x13b   : > { %v693_v51 = vadd.f32 %v692_v50, %v674_v49 }
 0x13d   : > { %v701_v52 = vsel %vm700_vm4, -1e+09, %v693_v51 }
 0x13e   : > { %v702_v53 = vsel %vm676_vm2, %v701_v52, -inf }
 0x13f   : > { %703 = vmax.xlane.f32.xlu0 %v702_v53 }
 0x142   : > { %v694_v54 = vpop.f32.mrf.mxu3 }
 0x1b2   : > { %v704_v56 = vpop.xlane.xlu0 %703 }
 0x1b3   : > { %v705_v57 = vsub.f32 %v701_v52, %v704_v56 }
 0x1b5   : > { %v706_v58 = vmul.f32 1.442695, %v705_v57 }
 0x1b7   : > { %1053 = vpow2.f32 %v706_v58 }
 0x1bd   : > { %v1054_v59 = vpop.eup %1053 }
 0x1be   : > { %v708_v60 = vsel %vm676_vm2, %v1054_v59, 0.0  ;;  %v712_v61 = vpack.c.bf16 %v1054_v59, %v1054_v59 }
 0x1bf   : > { %709 = vadd.xlane.f32.xlu0 %v708_v60 }
 0x1c0   : > { %997 = vmatmul.msk.bf16.vlgmr.msrb.gmra.mxu0 %vm676_vm2, %v712_v61 }
 0x232   : > { %v710_v62 = vpop.xlane.xlu0 %709 }
 0x233   : > { %1055 = vrcp.f32 %v710_v62 }
 0x239   : > { %v1056_v63 = vpop.eup %1055 }
 0x23d   : > { %v730_v3 = vpop.f32.mrf.mxu0 }
 0x23e   : > { %v734_v5 = vmul.f32 %v1056_v63, %v730_v3 }
 0x240   : > { %v736_v6 = vpack.c.bf16 %v734_v5, %v734_v5 }
 0x242   : > { %998 = vmatmul.msk.bf16.vlgmr.msrb.gmra.mxu1 %vm676_vm2, %v736_v6 }
 0x245   : > { %v732_v7 = vpop.f32.mrf.mxu0 }
 0x2bf   : > { %v752_v9 = vpop.f32.mrf.mxu1 }
 0x2c0   : > { %v756_v10 = vadd.f32 %v752_v9, %v735_v8 }
 0x2c2   : > { %757 = vst.msk [vmem:[#allocation2] sm:$0xff] %vm598_vm1, %v756_v10 }
 0x2c3   : > { %761 = sbr.rel (%p999_p8) target bundleno = 987 (0x3db), region = 76 }
 0x2c7   : > { %v754_v11 = vpop.f32.mrf.mxu1 }
 0x2c8   : > { %v765_v13 = vperm.slane %v1204_v0, 0  ;;  %v1102_v17 = vmov 32.0   ;;  %v798_v36 = vperm.slane %v1209_v1, 0  ;;  %v802_v38 = vperm.slane %v1214_v2, 0 }
 0x2c9   : > { %v762_v12 = vld [vmem:[#allocation2] sm:$0xff]  ;;  %1057 = vrcp.f32 %v1102_v17 }
 0x2ca   : > { %v763_v14 = vadd.f32 %v762_v12, %v1235_v4 }
 0x2cc   : > { %v767_v15 = vadd.f32 %v765_v13, %v763_v14 }
 0x2ce   : > { %v768_v16 = vsel %vm598_vm1, %v767_v15, 0.0 }
 0x2cf   : > { %769 = vadd.xlane.f32.xlu0 %v768_v16  ;;  %v1058_v18 = vpop.eup %1057 }
 0x2d0   : > { %v772_v19 = vmul.f32 32.0, %v1058_v18  ;;  %vm776_vm5 = vweird.f32 %v1058_v18 }
 0x2d2   : > { %v773_v20 = vsub.f32 1.0, %v772_v19 }
 0x2d4   : > { %v774_v21 = vmul.f32 %v1058_v18, %v773_v20 }
 0x2d6   : > { %v775_v22 = vadd.f32 %v1058_v18, %v774_v21 }
 0x2d8   : > { %v777_v23 = vsel %vm776_vm5, %v1058_v18, %v775_v22 }
 0x342   : > { %v770_v24 = vpop.xlane.xlu0 %769 }
 0x343   : > { %v778_v25 = vmul.f32 %v777_v23, %v770_v24 }
 0x345   : > { %v779_v26 = vsub.f32 %v767_v15, %v778_v25 }
 0x347   : > { %v780_v27 = vmul.f32 %v779_v26, %v779_v26 }
 0x349   : > { %v781_v0 = vsel %vm598_vm1, %v780_v27, 0.0 }
 0x34a   : > { %782 = vadd.xlane.f32.xlu0 %v781_v0 }
 0x3bd   : > { %v783_v4 = vpop.xlane.xlu0 %782 }
 0x3be   : > { %v784_v28 = vmul.f32 %v783_v4, %v777_v23 }
 0x3c0   : > { %v785_v29 = vadd.f32 1e-05, %v784_v28 }
 0x3c2   : > { %1059 = vrsqrt.f32 %v785_v29  ;;  %vm792_vm7 = vweird.f32 %v785_v29 }
 0x3c8   : > { %v1060_v30 = vpop.eup %1059 }
 0x3c9   : > { %v787_v31 = vmul.f32 %v1060_v30, %v785_v29  ;;  %vm793_vm6 = vweird.f32 %v1060_v30 }
 0x3ca   : > { %vm794_vm8 = vmor %vm792_vm7, %vm793_vm6 }
 0x3cb   : > { %v788_v32 = vmul.f32 %v1060_v30, %v787_v31 }
 0x3cd   : > { %v789_v33 = vmul.f32 0.5, %v788_v32 }
 0x3cf   : > { %v790_v34 = vsub.f32 1.5, %v789_v33 }
 0x3d1   : > { %v791_v35 = vmul.f32 %v1060_v30, %v790_v34 }
 0x3d3   : > { %v795_v37 = vsel %vm794_vm8, %v1060_v30, %v791_v35 }
 0x3d4   : > { %v796_v39 = vmul.f32 %v795_v37, %v779_v26 }
 0x3d6   : > { %v800_v40 = vmul.f32 %v798_v36, %v796_v39 }
 0x3d8   : > { %v804_v41 = vadd.f32 %v802_v38, %v800_v40 }
 0x3da   : > { %805 = vst.msk [vmem:[%s1255_s28] sm:$0xff] %vm598_vm1, %v804_v41 }
 0x3db PF: > { %s22_s25 = sadd.s32 1, %s1099_s25   ;;  %s1326_s0 = sld [smem:[#allocation3_spill]] }
 0x3dc   : > { %p19_p9 = scmp.ge.s32.totalorder %s22_s25, 10   ;;  %s1327_s21 = smov %s1091_s23 }
 0x3dd   : > { %s1328_s22 = smov %s1095_s24  ;;  %s1329_s23 = smov %s1332_s26 }
 0x3de   :  { %21 = sbr.rel (!%p19_p9) target bundleno = 7 (0x7), region = 130 }
 0x3e1   : > { %s1330_s24 = smov %s1326_s0 }

// kernel: decoder_layer.4
= control target key start
LH: loop header
LB: loop body
LE: loop exit
PB: predicated region body
PF: predicated region fallthrough
CT: control target
= control target key end

     0   :  { %s1229_s25 = smov 0   ;;  %s1231_s26 = smov 0   ;;  %s1369_s0 = inlined_call_operand.vmem [shape: f32[2,8,32], index: 0, kind: input, shape index: {}]   ;;  %s1370_s1 = inlined_call_operand.vmem [shape: f32[2,8,32], index: 1, kind: input, shape index: {}]   ;;  %s1371_s2 = inlined_call_operand.vmem [shape: f32[2,1,8], index: 2, kind: input, shape index: {}]   ;;  %s1372_s3 = inlined_call_operand.vmem [shape: bf16[4,32,8], index: 3, kind: input, shape index: {}]   ;;  %s1373_s4 = inlined_call_operand.vmem [shape: f32[4,1,8], index: 4, kind: input, shape index: {}]   ;;  %s1374_s5 = inlined_call_operand.vmem [shape: bf16[4,32,8], index: 5, kind: input, shape index: {}]   ;;  %s1375_s6 = inlined_call_operand.vmem [shape: f32[4,1,8], index: 6, kind: input, shape index: {}]   ;;  %s1376_s7 = inlined_call_operand.vmem [shape: bf16[4,32,8], index: 7, kind: input, shape index: {}]   ;;  %s1377_s8 = inlined_call_operand.vmem [shape: f32[4,1,8], index: 8, kind: input, shape index: {}]   ;;  %s1378_s9 = inlined_call_operand.vmem [shape: bf16[4,8,32], index: 9, kind: input, shape index: {}]   ;;  %s1379_s10 = inlined_call_operand.vmem [shape: f32[1,32], index: 10, kind: input, shape index: {}]   ;;  %s1380_s11 = inlined_call_operand.vmem [shape: f32[1,32], index: 11, kind: input, shape index: {}]   ;;  %s1381_s12 = inlined_call_operand.vmem [shape: f32[1,32], index: 12, kind: input, shape index: {}]   ;;  %s1382_s13 = inlined_call_operand.vmem [shape: f32[2,8,32], index: 13, kind: output, shape index: {}]  }
   0x1   :  { %1383 = sst [smem:[#allocation4_spill]] %s1369_s0  ;;  %s1233_s27 = smov 0  }
   0x2   :  { %1384 = sst [smem:[#allocation5_spill]] %s1370_s1  ;;  %s1235_s28 = smov 0  }
   0x3   :  { %1385 = sst [smem:[#allocation6_spill]] %s1371_s2  ;;  %s1237_s29 = smov 0  }
   0x4   :  { %1386 = sst [smem:[#allocation7_spill]] %s1372_s3 }
   0x5   :  { %1387 = sst [smem:[#allocation8_spill]] %s1379_s10 }
   0x6   :  { %1388 = sst [smem:[#allocation9_spill]] %s1380_s11 }
   0x7   :  { %1389 = sst [smem:[#allocation10_spill]] %s1381_s12 }
   0x8 LB: > { %s32_s30 = sadd.s32 1, %s1147_s27  ;;  %s35_s14 = sadd.s32 1, %s1151_s28  ;;  %s1155_s29 = sphi %s1237_s29, %s23_s29   ;;  %s1151_s28 = sphi %s1235_s28, %s1402_s28   ;;  %s1147_s27 = sphi %s1233_s27, %s1401_s27   ;;  %s1143_s26 = sphi %s1231_s26, %s1400_s26   ;;  %s1139_s25 = sphi %s1229_s25, %s1399_s25  }
   0x9   : > { %p33_p0 = scmp.ge.s32.totalorder %s32_s30, 4  ;;  %p1013_p1 = scmp.ge.s32.totalorder %s1155_s29, 1 }
   0xa   : > { %p478_p2 = scmp.lt.s32.totalorder %s1155_s29, 9 }
   0xb   : > { %s1404_s30 = smov (%p33_p0, %s32_s30), 0  ;;  %s1406_s14 = smov (!%p33_p0, %s35_s14), %s1151_s28 }
   0xc   : > { %p479_p3 = pnand %p1013_p1, %p478_p2  ;;  %p37_p4 = scmp.ge.s32.totalorder %s1406_s14, 2 }
   0xd   : > { %p555_p5 = scmp.lt.s32.totalorder (!%p479_p3), %s1143_s26, 1  ;;  %p566_p6 = scmp.lt.s32.totalorder (!%p479_p3), %s1139_s25, 3 }
   0xe   : > { %s1408_s14 = smov (%p37_p4, %s1406_s14), 0  ;;  %482 = sbr.rel (%p479_p3) target bundleno = 988 (0x3dc), region = 72 }
   0xf   : > { %1390 = sst [smem:[#allocation3_spill]] %s1408_s14  ;;  %p1024_p7 = scmp.ne.s32.totalorder (!%p479_p3), %s1139_s25, 0 }
  0x10   : > { %s1391_s10 = sld [smem:[#allocation8_spill]] (!%p479_p3) }
  0x11   : > { %s1392_s11 = sld [smem:[#allocation9_spill]] (!%p479_p3) }
  0x12   : > { %s1393_s12 = sld [smem:[#allocation10_spill]] (!%p479_p3) }
  0x13   : > { %s1410_s26 = smov (!%p555_p5, %s1143_s26), 1  ;;  %s1394_s2 = sld [smem:[#allocation6_spill]] }
  0x14   : > { %s1278_s21 = scalar_select %p566_p6, %s1139_s25, 3 }
  0x15   : > { %s1280_s22 = sshll.u32 %s1410_s26, 3  ;;  %s1395_s0 = sld [smem:[#allocation4_spill]] }
  0x16   : > { %v1265_v0 = vld [vmem:[%s1391_s10] sm:$0x1]  ;;  %s1396_s1 = sld [smem:[#allocation5_spill]]  ;;  %s573_s23 = scalar_lea.vmem %s1373_s4, %s1278_s21 }
  0x17   : > { %v1270_v1 = vld [vmem:[%s1392_s11] sm:$0x1]  ;;  %s1058_s11 = sshll.u32 %s1278_s21, 4  ;;  %s1397_s3 = sld [smem:[#allocation7_spill]] }
  0x18   : > { %v1275_v2 = vld [vmem:[%s1393_s12] sm:$0x1]  ;;  %s578_s19 = scalar_lea.vmem %s1374_s5, %s1058_s11  ;;  %s586_s14 = scalar_lea.vmem %s1376_s7, %s1058_s11 }
  0x19   : > { %s565_s15 = scalar_lea.vmem %s1394_s2, %s1410_s26  ;;  %v606_v6 = vld [vmem:[%s573_s23] sm:$0x1]  ;;  %s589_s26 = scalar_lea.vmem %s1377_s8, %s1278_s21  ;;  %v1063_v12 = vld [vmem:[%s578_s19] sm:$0xf0]  ;;  %v1040_v13 = vld [vmem:[%s578_s19 + $0x8] sm:$0xf] }
  0x1a   : > { %v1293_v3 = vld [vmem:[%s565_s15] sm:$0x1]  ;;  %s1022_s24 = sshll.u32 %s1278_s21, 2  ;;  %v1064_v14 = vld [vmem:[%s578_s19 + $0x8] sm:$0xf0] }
  0x1b   : > { %s558_s18 = scalar_lea.vmem %s1395_s0, %s1280_s22  ;;  %v1036_v11 = vld [vmem:[%s578_s19] sm:$0xf]  ;;  %s593_s17 = scalar_lea.vmem %s1378_s9, %s1022_s24  ;;  %v1065_v17 = vld [vmem:[%s586_s14] sm:$0xf0]  ;;  %v1049_v18 = vld [vmem:[%s586_s14 + $0x8] sm:$0xf] }
  0x1c   : > { %s562_s10 = scalar_lea.vmem %s1396_s1, %s1280_s22  ;;  %v1300_v4 = vld [vmem:[%s558_s18] sm:$0xff]  ;;  %s581_s1 = scalar_lea.vmem %s1375_s6, %s1278_s21  ;;  %v1066_v19 = vld [vmem:[%s586_s14 + $0x8] sm:$0xf0] }
  0x1d   : > { %v600_v5 = vld [vmem:[%s562_s10] sm:$0xff]  ;;  %s570_s16 = scalar_lea.vmem %s1397_s3, %s1058_s11  ;;  %s597_s3 = scalar_lea.vmem %s1382_s13, %s1280_s22 }
  0x1e   : > { %v1027_v7 = vld [vmem:[%s570_s16] sm:$0xf]  ;;  %v1061_v8 = vld [vmem:[%s570_s16] sm:$0xf0]  ;;  %v1031_v9 = vld [vmem:[%s570_s16 + $0x8] sm:$0xf] }
  0x1f   : > { %v1062_v10 = vld [vmem:[%s570_s16 + $0x8] sm:$0xf0]  ;;  %v611_v15 = vld [vmem:[%s581_s1] sm:$0x1]  ;;  %624 = sbr.rel (%p1024_p7) target bundleno = 38 (0x26), region = 76 }
  0x20   : > { %v1045_v16 = vld [vmem:[%s586_s14] sm:$0xf] }
  0x21   : > { %v616_v20 = vld [vmem:[%s589_s26] sm:$0x1] }
  0x22   : > { %v617_v21 = vld [vmem:[%s593_s17] sm:$0xf] }
  0x24   : > { %vm625_vm0 = vcmask 261120   ;;  %v1157_v22 = vmov 0.0  }
  0x25   : > { %626 = vst.msk [vmem:[#allocation2] sm:$0xff] %vm625_vm0, %v1157_v22 }
  0x26 PF: > { %v1032_v23 = vor.u32 %v1062_v10, %v1031_v9  ;;  %v1041_v24 = vor.u32 %v1064_v14, %v1040_v13  ;;  %v1028_v25 = vor.u32 %v1061_v8, %v1027_v7  ;;  %v1037_v26 = vor.u32 %v1063_v12, %v1036_v11  ;;  %p1055_p8 = scmp.ne.s32.totalorder %s1139_s25, 3 }
  0x27   : > { %v627_v27 = vpack.c.bf16 %v1300_v4, %v1300_v4  ;;  %v628_v28 = vpack.c.bf16 %v600_v5, %v600_v5  ;;  %vm644_vm1 = vcmask 261120   ;;  %v1050_v29 = vor.u32 %v1066_v19, %v1049_v18 }
  0x28   : > { %654 = vmatpush.bf16.msra.mxu0 %v1032_v23  ;;  %685 = vmatpush.bf16.msra.mxu1 %v1041_v24  ;;  %v1046_v30 = vor.u32 %v1065_v17, %v1045_v16  ;;  %v662_v31 = vperm.slane %v611_v15, 0  ;;  %v630_v34 = vperm.slane %v606_v6, 0  ;;  %vm725_vm2 = vcmask 64512  }
  0x29   : > { %713 = vmatpush.bf16.msra.mxu2 %v1050_v29  ;;  %v693_v42 = vperm.slane %v616_v20, 0  ;;  %vm760_vm3 = vcmask 1043456   ;;  %v723_v48 = vperm.slane %v1293_v3, 0 }
  0x2a   : > { %v784_v53 = vsel %vm760_vm3, %v617_v21, 0 }
  0x2c   : > { %655 = vmatpush.bf16.msra.mxu0 %v1028_v25  ;;  %686 = vmatpush.bf16.msra.mxu1 %v1037_v26  ;;  %v778_v6 = vld [vmem:[#allocation2] sm:$0xff] }
  0x2d   : > { %714 = vmatpush.bf16.msra.mxu2 %v1046_v30 }
  0x2f   : > { %1033 = vmatmul.msk.bf16.vlgmr.msra.gmra.mxu0 %vm644_vm1, %v627_v27  ;;  %1042 = vmatmul.msk.bf16.vlgmr.msra.gmra.mxu1 %vm644_vm1, %v628_v28 }
  0x30   : > { %1051 = vmatmul.msk.bf16.vlgmr.msra.gmra.mxu2 %vm644_vm1, %v628_v28  ;;  %793 = vmatpush.bf16.msrb.mxu1 %v784_v53 }
  0xac   : > { %v657_v32 = vpop.f32.mrf.mxu0  ;;  %v688_v33 = vpop.f32.mrf.mxu1 }
  0xad   : > { %v689_v35 = vadd.f32 %v688_v33, %v662_v31  ;;  %v658_v37 = vadd.f32 %v657_v32, %v630_v34 }
  0xaf   : > { %v721_v36 = vpack.c.bf16 %v689_v35, %v689_v35  ;;  %v720_v41 = vpack.c.bf16 %v658_v37, %v658_v37 }
  0xb1   : > { %v730_v38 = vsel %vm725_vm2, %v721_v36, 0 }
  0xb2   : > { %739 = vmatpush.bf16.xpose.msra.mxu3 %v730_v38 }
  0xb3   : > { %v716_v43 = vpop.f32.mrf.mxu2 }
  0xb4   : > { %v659_v39 = vpop.f32.mrf.mxu0  ;;  %v690_v40 = vpop.f32.mrf.mxu1  ;;  %v717_v44 = vadd.f32 %v716_v43, %v693_v42 }
  0xb6   : > { %v756_v45 = vpack.c.bf16 %v717_v44, %v717_v44 }
  0xb8   : > { %v762_v46 = vsel %vm760_vm3, %v756_v45, 0 }
  0xb9   : > { %1052 = vmatmul.msk.bf16.vlgmr.msra.gmra.mxu3 %vm725_vm2, %v720_v41  ;;  %771 = vmatpush.bf16.msrb.mxu0 %v762_v46 }
  0xbb   : > { %v718_v47 = vpop.f32.mrf.mxu2 }
 0x13c   : > { %v741_v49 = vpop.f32.mrf.mxu3 }
 0x13d   : > { %v742_v50 = vadd.f32 %v741_v49, %v723_v48 }
 0x13f   : > { %v745_v51 = vsel %vm725_vm2, %v742_v50, -inf }
 0x140   : > { %746 = vmax.xlane.f32.xlu0 %v745_v51 }
 0x144   : > { %v743_v52 = vpop.f32.mrf.mxu3 }
 0x1b3   : > { %v747_v54 = vpop.xlane.xlu0 %746 }
 0x1b4   : > { %v748_v55 = vsub.f32 %v742_v50, %v747_v54 }
 0x1b6   : > { %v749_v56 = vmul.f32 1.442695, %v748_v55 }
 0x1b8   : > { %1109 = vpow2.f32 %v749_v56 }
 0x1be   : > { %v1110_v57 = vpop.eup %1109 }
 0x1bf   : > { %v751_v58 = vsel %vm725_vm2, %v1110_v57, 0.0  ;;  %v755_v59 = vpack.c.bf16 %v1110_v57, %v1110_v57 }
 0x1c0   : > { %752 = vadd.xlane.f32.xlu0 %v751_v58 }
 0x1c1   : > { %1053 = vmatmul.msk.bf16.vlgmr.msrb.gmra.mxu0 %vm725_vm2, %v755_v59 }
 0x233   : > { %v753_v60 = vpop.xlane.xlu0 %752 }
 0x234   : > { %1111 = vrcp.f32 %v753_v60 }
 0x23a   : > { %v1112_v61 = vpop.eup %1111 }
 0x23e   : > { %v773_v62 = vpop.f32.mrf.mxu0 }
 0x23f   : > { %v777_v63 = vmul.f32 %v1112_v61, %v773_v62 }
 0x241   : > { %v779_v3 = vpack.c.bf16 %v777_v63, %v777_v63 }
 0x243   : > { %1054 = vmatmul.msk.bf16.vlgmr.msrb.gmra.mxu1 %vm725_vm2, %v779_v3 }
 0x246   : > { %v775_v5 = vpop.f32.mrf.mxu0 }
 0x2c0   : > { %v795_v7 = vpop.f32.mrf.mxu1 }
 0x2c1   : > { %v799_v8 = vadd.f32 %v795_v7, %v778_v6 }
 0x2c3   : > { %800 = vst.msk [vmem:[#allocation2] sm:$0xff] %vm644_vm1, %v799_v8 }
 0x2c4   : > { %804 = sbr.rel (%p1055_p8) target bundleno = 988 (0x3dc), region = 80 }
 0x2c8   : > { %v797_v9 = vpop.f32.mrf.mxu1 }
 0x2c9   : > { %v808_v11 = vperm.slane %v1265_v0, 0  ;;  %v1158_v15 = vmov 32.0   ;;  %v841_v34 = vperm.slane %v1270_v1, 0  ;;  %v845_v36 = vperm.slane %v1275_v2, 0 }
 0x2ca   : > { %v805_v10 = vld [vmem:[#allocation2] sm:$0xff]  ;;  %1113 = vrcp.f32 %v1158_v15 }
 0x2cb   : > { %v806_v12 = vadd.f32 %v805_v10, %v1300_v4 }
 0x2cd   : > { %v810_v13 = vadd.f32 %v808_v11, %v806_v12 }
 0x2cf   : > { %v811_v14 = vsel %vm644_vm1, %v810_v13, 0.0 }
 0x2d0   : > { %812 = vadd.xlane.f32.xlu0 %v811_v14  ;;  %v1114_v16 = vpop.eup %1113 }
 0x2d1   : > { %v815_v17 = vmul.f32 32.0, %v1114_v16  ;;  %vm819_vm4 = vweird.f32 %v1114_v16 }
 0x2d3   : > { %v816_v18 = vsub.f32 1.0, %v815_v17 }
 0x2d5   : > { %v817_v19 = vmul.f32 %v1114_v16, %v816_v18 }
 0x2d7   : > { %v818_v20 = vadd.f32 %v1114_v16, %v817_v19 }
 0x2d9   : > { %v820_v21 = vsel %vm819_vm4, %v1114_v16, %v818_v20 }
 0x343   : > { %v813_v22 = vpop.xlane.xlu0 %812 }
 0x344   : > { %v821_v23 = vmul.f32 %v820_v21, %v813_v22 }
 0x346   : > { %v822_v24 = vsub.f32 %v810_v13, %v821_v23 }
 0x348   : > { %v823_v25 = vmul.f32 %v822_v24, %v822_v24 }
 0x34a   : > { %v824_v0 = vsel %vm644_vm1, %v823_v25, 0.0 }
 0x34b   : > { %825 = vadd.xlane.f32.xlu0 %v824_v0 }
 0x3be   : > { %v826_v4 = vpop.xlane.xlu0 %825 }
 0x3bf   : > { %v827_v26 = vmul.f32 %v826_v4, %v820_v21 }
 0x3c1   : > { %v828_v27 = vadd.f32 1e-05, %v827_v26 }
 0x3c3   : > { %1115 = vrsqrt.f32 %v828_v27  ;;  %vm835_vm6 = vweird.f32 %v828_v27 }
 0x3c9   : > { %v1116_v28 = vpop.eup %1115 }
 0x3ca   : > { %v830_v29 = vmul.f32 %v1116_v28, %v828_v27  ;;  %vm836_vm5 = vweird.f32 %v1116_v28 }
 0x3cb   : > { %vm837_vm7 = vmor %vm835_vm6, %vm836_vm5 }
 0x3cc   : > { %v831_v30 = vmul.f32 %v1116_v28, %v830_v29 }
 0x3ce   : > { %v832_v31 = vmul.f32 0.5, %v831_v30 }
 0x3d0   : > { %v833_v32 = vsub.f32 1.5, %v832_v31 }
 0x3d2   : > { %v834_v33 = vmul.f32 %v1116_v28, %v833_v32 }
 0x3d4   : > { %v838_v35 = vsel %vm837_vm7, %v1116_v28, %v834_v33 }
 0x3d5   : > { %v839_v37 = vmul.f32 %v838_v35, %v822_v24 }
 0x3d7   : > { %v843_v38 = vmul.f32 %v841_v34, %v839_v37 }
 0x3d9   : > { %v847_v39 = vadd.f32 %v845_v36, %v843_v38 }
 0x3db   : > { %848 = vst.msk [vmem:[%s597_s3] sm:$0xff] %vm644_vm1, %v847_v39 }
 0x3dc PF: > { %s23_s29 = sadd.s32 1, %s1155_s29   ;;  %s1398_s11 = sld [smem:[#allocation3_spill]] }
 0x3dd   : > { %p20_p9 = scmp.ge.s32.totalorder %s23_s29, 10   ;;  %s1399_s25 = smov %s1147_s27 }
 0x3de   : > { %s1400_s26 = smov %s1151_s28  ;;  %s1401_s27 = smov %s1404_s30 }
 0x3df   :  { %22 = sbr.rel (!%p20_p9) target bundleno = 8 (0x8), region = 137 }
 0x3e2   : > { %s1402_s28 = smov %s1398_s11 }

</bundles_post_ra>
